<compile_context>
chip_gen: v7x
topology: tpu7x:2x2x1
jax: 0.10.0
libtpu: 0.0.40
codegen_flags: <defaults>
</compile_context>

<pallas_src>
import functools

import jax
import jax.numpy as jnp
from jax import lax
from jax.experimental import pallas as pl
from jax.experimental.pallas import tpu as pltpu

H = 50          # true hidden size (PyTorch)
HP = 128        # padded hidden size (lane-aligned; equals the MXU contraction width)
INPUT_SIZE = 1


def _make_lstm_kernel(t_chunk, t_total, unroll, needs_mask):
    """Builds the kernel body with static chunk/unroll/mask parameters baked in."""

    def kernel(x_ref, w_ih_ref, w_hh_ref, b_ref, fcw_ref, fcb_ref,
               out_ref, h_scr, c_scr):
        # x_ref:    (T_CHUNK, B_TILE, 1)  time-major input chunk
        # w_ih_ref: (1, 4*HP)   input->gate weights (per-gate zero-padded), f32
        # w_hh_ref: (HP, 4*HP)  hidden->gate weights, matmul dtype (bf16 or f32)
        # b_ref:    (1, 4*HP)   b_ih + b_hh, f32
        # fcw_ref:  (1, HP), fcb_ref: (1, 1)
        # out_ref:  (B_TILE, 1)
        # h_scr / c_scr: (B_TILE, HP) f32 recurrent state, persistent across T-chunks.
        t_blk = pl.program_id(1)

        @pl.when(t_blk == 0)
        def _init():
            h_scr[...] = jnp.zeros_like(h_scr)
            c_scr[...] = jnp.zeros_like(c_scr)

        # Loop-invariant parameter reads hoisted out of the timestep loop.
        w_ih_row = w_ih_ref[...]           # (1, 4*HP) f32
        bias_row = b_ref[...]              # (1, 4*HP) f32

        def step(s, carry):
            h, c = carry
            x_t = x_ref[s]                                       # (B_TILE, 1)
            # Input projection: VPU broadcast multiply (no K=1 matmul), bias folded in.
            xb = x_t * w_ih_row + bias_row                       # (B_TILE, 4*HP) f32
            gates = xb + jnp.dot(h.astype(w_hh_ref.dtype), w_hh_ref[...],
                                 preferred_element_type=jnp.float32)
            # PyTorch gate order: i, f, g, o (each padded to HP lanes).
            i_g = jax.nn.sigmoid(gates[:, 0 * HP:1 * HP])
            f_g = jax.nn.sigmoid(gates[:, 1 * HP:2 * HP])
            g_g = jnp.tanh(gates[:, 2 * HP:3 * HP])
            o_g = jax.nn.sigmoid(gates[:, 3 * HP:4 * HP])
            c_new = f_g * c + i_g * g_g
            h_new = o_g * jnp.tanh(c_new)
            if needs_mask:
                # Trailing padded timesteps (last chunk only): freeze h/c.
                valid = (t_blk * t_chunk + s) < t_total
                h_new = jnp.where(valid, h_new, h)
                c_new = jnp.where(valid, c_new, c)
            return (h_new, c_new)

        # State carried in vregs; scratch touched once per chunk.
        h_fin, c_fin = lax.fori_loop(0, t_chunk, step,
                                     (h_scr[...], c_scr[...]), unroll=unroll)
        h_scr[...] = h_fin
        c_scr[...] = c_fin

        # Final Linear on the last hidden state, only on the last T-chunk:
        # VPU multiply + lane reduction (XLU) instead of an N=1 MXU matmul.
        @pl.when(t_blk == pl.num_programs(1) - 1)
        def _fc():
            out_ref[...] = (jnp.sum(h_fin * fcw_ref[...], axis=-1, keepdims=True)
                            + fcb_ref[...]).astype(out_ref.dtype)

    return kernel


def _round_up(x, m):
    return ((x + m - 1) // m) * m


def _tensorcores_per_chip():
    """Best-effort detection of 2-TensorCore chips (v7x); defaults to 1."""
    try:
        kind = jax.devices()[0].device_kind.lower()
    except Exception:
        return 1
    return 2 if "v7" in kind else 1


@functools.partial(jax.jit, static_argnames=("matmul_dtype",))
def lstm_model_forward(x, params, matmul_dtype=jnp.bfloat16):
    """x: (B, T, 1) float32 -> (B, 1) float32. Matches PyTorch LSTMModel.forward."""
    w_ih, w_hh, b_ih, b_hh, fc_w, fc_b = (
        params["w_ih"], params["w_hh"], params["b_ih"], params["b_hh"],
        params["fc_w"], params["fc_b"])
    B, T, _ = x.shape

    # ---- batch tiling (static): sublane-aligned, vreg-pressure capped at 64 rows ----
    B_TILE = min(_round_up(B, 8), 64)
    if _tensorcores_per_chip() >= 2 and B >= 16 and _round_up(B, B_TILE) // B_TILE < 2:
        # v7x: ensure >= 2 blocks on the "parallel" batch axis so both TCs are busy.
        B_TILE = min(_round_up((B + 1) // 2, 8), 64)
    BP = _round_up(B, B_TILE)

    # ---- time chunking (static): cdiv grid, trailing steps masked in-kernel ----
    T_CHUNK = min(T, 512)
    NT = -(-T // T_CHUNK)                     # cdiv
    T_PAD = NT * T_CHUNK
    needs_mask = (T_PAD != T)

    # unroll tied to vreg budget (per-step live set scales with B_TILE).
    if B_TILE <= 32:
        unroll = 8
    elif B_TILE <= 64:
        unroll = 4
    else:
        unroll = 2
    unroll = max(1, min(unroll, T_CHUNK))

    grid = (BP // B_TILE, NT)                 # (parallel batch blocks, sequential T-chunks)

    # ---- pack parameters: right-multiply layout, each gate zero-padded H -> HP ----
    def pack_gate_cols(w):                    # (4H, K) -> (K, 4*HP)
        k = w.shape[1]
        w4 = jnp.pad(w.reshape(4, H, k), ((0, 0), (0, HP - H), (0, 0)))
        return jnp.transpose(w4, (2, 0, 1)).reshape(k, 4 * HP).astype(jnp.float32)

    w_ih_p = pack_gate_cols(w_ih)                                          # (1, 4*HP)
    w_hh_p = jnp.zeros((HP, 4 * HP), jnp.float32).at[:H].set(pack_gate_cols(w_hh))
    w_hh_p = w_hh_p.astype(matmul_dtype)                                   # bf16 MXU operands
    b_p = pack_gate_cols((b_ih + b_hh)[:, None])                           # (1, 4*HP)
    fcw_p = jnp.zeros((1, HP), jnp.float32).at[0, :H].set(fc_w[0].astype(jnp.float32))
    fcb_p = fc_b.reshape(1, 1).astype(jnp.float32)

    # ---- x time-major (T_PAD, BP, 1): per-step kernel access is a leading-axis index ----
    x_tm = jnp.transpose(x.astype(jnp.float32), (1, 0, 2))                 # (T, B, 1)
    x_tm = jnp.pad(x_tm, ((0, T_PAD - T), (0, BP - B), (0, 0)))            # (T_PAD, BP, 1)

    kernel = _make_lstm_kernel(T_CHUNK, T, unroll, needs_mask)

    out = pl.pallas_call(
        kernel,
        out_shape=jax.ShapeDtypeStruct((BP, 1), jnp.float32),
        grid_spec=pltpu.PrefetchScalarGridSpec(
            num_scalar_prefetch=0,
            grid=grid,
            in_specs=[
                pl.BlockSpec((T_CHUNK, B_TILE, 1), lambda b, t: (t, b, 0)),   # x (streamed)
                pl.BlockSpec((1, 4 * HP), lambda b, t: (0, 0)),               # w_ih (resident)
                pl.BlockSpec((HP, 4 * HP), lambda b, t: (0, 0)),              # w_hh (resident)
                pl.BlockSpec((1, 4 * HP), lambda b, t: (0, 0)),               # bias
                pl.BlockSpec((1, HP), lambda b, t: (0, 0)),                   # fc weight row
                pl.BlockSpec((1, 1), lambda b, t: (0, 0)),                    # fc bias
            ],
            out_specs=pl.BlockSpec((B_TILE, 1), lambda b, t: (b, 0)),
            scratch_shapes=[pltpu.VMEM((B_TILE, HP), jnp.float32),   # h
                            pltpu.VMEM((B_TILE, HP), jnp.float32)],  # c
        ),
        compiler_params=pltpu.CompilerParams(
            dimension_semantics=("parallel", "arbitrary")),
    )(x_tm, w_ih_p, w_hh_p, b_p, fcw_p, fcb_p)
    return out[:B]


def init_params(key):
    """Deterministic init matching PyTorch shapes (uniform(-1/sqrt(H), 1/sqrt(H)))."""
    ks = jax.random.split(key, 6)
    bound = 1.0 / jnp.sqrt(jnp.float32(H))

    def u(k, shape):
        return jax.random.uniform(k, shape, jnp.float32, -bound, bound)

    return {
        "w_ih": u(ks[0], (4 * H, INPUT_SIZE)),   # weight_ih_l0
        "w_hh": u(ks[1], (4 * H, H)),            # weight_hh_l0
        "b_ih": u(ks[2], (4 * H,)),              # bias_ih_l0
        "b_hh": u(ks[3], (4 * H,)),              # bias_hh_l0
        "fc_w": u(ks[4], (1, H)),                # fc.weight
        "fc_b": u(ks[5], (1,)),                  # fc.bias
    }


def reference_forward(x, p):
    """Pure-JAX reference replicating PyTorch LSTM semantics."""
    B, T, _ = x.shape
    h = jnp.zeros((B, H), jnp.float32)
    c = jnp.zeros((B, H), jnp.float32)

    def step(carry, x_t):
        h, c = carry
        gates = x_t @ p["w_ih"].T + h @ p["w_hh"].T + p["b_ih"] + p["b_hh"]
        i = jax.nn.sigmoid(gates[:, 0 * H:1 * H])
        f = jax.nn.sigmoid(gates[:, 1 * H:2 * H])
        g = jnp.tanh(gates[:, 2 * H:3 * H])
        o = jax.nn.sigmoid(gates[:, 3 * H:4 * H])
        c = f * c + i * g
        h = o * jnp.tanh(c)
        return (h, c), None

    (h, _), _ = lax.scan(step, (h, c), jnp.transpose(x, (1, 0, 2)))
    return h @ p["fc_w"].T + p["fc_b"]


if __name__ == "__main__":
    key = jax.random.PRNGKey(0)
    k_param, k_x = jax.random.split(key)

    B, T = 2, 8
    x = jax.random.normal(k_x, (B, T, INPUT_SIZE), jnp.float32)
    params = init_params(k_param)
    ref = reference_forward(x, params)

    # Exact-numerics path (f32 MXU operands).
    out_f32 = jax.block_until_ready(
        lstm_model_forward(x, params, matmul_dtype=jnp.float32))
    assert out_f32.shape == (B, 1)
    assert jnp.allclose(out_f32, ref, rtol=1e-3, atol=1e-3), (out_f32, ref)

    # Default fast path (bf16 W_hh / h operands, f32 accumulate).
    out_bf16 = jax.block_until_ready(
        lstm_model_forward(x, params, matmul_dtype=jnp.bfloat16))
    assert out_bf16.shape == (B, 1)
    assert jnp.allclose(out_bf16, ref, rtol=2e-2, atol=2e-2), (out_bf16, ref)

    print("KERNEL_OK")
</pallas_src>

<mosaic_0001>
module attributes {stable_mosaic.version = 11 : i64} {
  func.func @kernel(%arg0: i32, %arg1: i32, %arg2: memref<8x8x1xf32, #tpu.memory_space<vmem>>, %arg3: memref<1x512xf32, #tpu.memory_space<vmem>>, %arg4: memref<128x512xf32, #tpu.memory_space<vmem>>, %arg5: memref<1x512xf32, #tpu.memory_space<vmem>>, %arg6: memref<1x128xf32, #tpu.memory_space<vmem>>, %arg7: memref<1x1xf32, #tpu.memory_space<vmem>>, %arg8: memref<8x1xf32, #tpu.memory_space<vmem>>, %arg9: memref<8x128xf32, #tpu.memory_space<vmem>>, %arg10: memref<8x128xf32, #tpu.memory_space<vmem>>) attributes {dimension_semantics = [#tpu.dimension_semantics<parallel>, #tpu.dimension_semantics<arbitrary>], iteration_bounds = array<i64: 1, 1>, scalar_prefetch = 0 : i64, scratch_operands = 2 : i64, tpu.core_type = #tpu.core_type<tc>, window_params = [{transform_indices = @transform_0, window_bounds = array<i64: 8, 8, 1>}, {pipeline_mode = #tpu.pipeline_mode<synchronous>, transform_indices = @transform_1, window_bounds = array<i64: 1, 512>}, {pipeline_mode = #tpu.pipeline_mode<synchronous>, transform_indices = @transform_2, window_bounds = array<i64: 128, 512>}, {pipeline_mode = #tpu.pipeline_mode<synchronous>, transform_indices = @transform_3, window_bounds = array<i64: 1, 512>}, {pipeline_mode = #tpu.pipeline_mode<synchronous>, transform_indices = @transform_4, window_bounds = array<i64: 1, 128>}, {pipeline_mode = #tpu.pipeline_mode<synchronous>, transform_indices = @transform_5, window_bounds = array<i64: 1, 1>}, {transform_indices = @transform_6, window_bounds = array<i64: 8, 1>}]} {
    %c0_i32 = arith.constant 0 : i32
    %0 = arith.cmpi eq, %arg1, %c0_i32 : i32
    %1 = arith.extui %0 : i1 to i32
    %c0_i32_0 = arith.constant 0 : i32
    %2 = arith.cmpi ne, %1, %c0_i32_0 : i32
    scf.if %2 {
      %cst_78 = arith.constant 0.000000e+00 : f32
      %300 = vector.broadcast %cst_78 : f32 to vector<8x128xf32>
      %c0_79 = arith.constant 0 : index
      %c0_80 = arith.constant 0 : index
      %301 = vector.load %arg9[%c0_79, %c0_80] : memref<8x128xf32, #tpu.memory_space<vmem>>, vector<8x128xf32>
      tpu.vector_store %arg9[%c0_79, %c0_80], %300 {strides = array<i32>} : memref<8x128xf32, #tpu.memory_space<vmem>>, vector<8x128xf32>,
      %cst_81 = arith.constant 0.000000e+00 : f32
      %302 = vector.broadcast %cst_81 : f32 to vector<8x128xf32>
      %c0_82 = arith.constant 0 : index
      %c0_83 = arith.constant 0 : index
      %303 = vector.load %arg10[%c0_82, %c0_83] : memref<8x128xf32, #tpu.memory_space<vmem>>, vector<8x128xf32>
      tpu.vector_store %arg10[%c0_82, %c0_83], %302 {strides = array<i32>} : memref<8x128xf32, #tpu.memory_space<vmem>>, vector<8x128xf32>,
    } else {
    }
    %c0 = arith.constant 0 : index
    %c0_1 = arith.constant 0 : index
    %3 = vector.load %arg3[%c0, %c0_1] : memref<1x512xf32, #tpu.memory_space<vmem>>, vector<1x512xf32>
    %c0_2 = arith.constant 0 : index
    %c0_3 = arith.constant 0 : index
    %4 = vector.load %arg5[%c0_2, %c0_3] : memref<1x512xf32, #tpu.memory_space<vmem>>, vector<1x512xf32>
    %c0_4 = arith.constant 0 : index
    %c0_5 = arith.constant 0 : index
    %5 = vector.load %arg9[%c0_4, %c0_5] : memref<8x128xf32, #tpu.memory_space<vmem>>, vector<8x128xf32>
    %c0_6 = arith.constant 0 : index
    %c0_7 = arith.constant 0 : index
    %6 = vector.load %arg10[%c0_6, %c0_7] : memref<8x128xf32, #tpu.memory_space<vmem>>, vector<8x128xf32>
    %c0_i32_8 = arith.constant 0 : i32
    %7 = arith.index_cast %c0_i32_8 : i32 to index
    %c0_9 = arith.constant 0 : index
    %c0_10 = arith.constant 0 : index
    %8 = vector.load %arg2[%7, %c0_9, %c0_10] : memref<8x8x1xf32, #tpu.memory_space<vmem>>, vector<1x8x1xf32>
    %9 = vector.shape_cast %8 : vector<1x8x1xf32> to vector<8x1xf32>
    %10 = vector.broadcast %9 : vector<8x1xf32> to vector<8x512xf32>
    %11 = vector.broadcast %3 : vector<1x512xf32> to vector<8x512xf32>
    %12 = arith.mulf %10, %11 : vector<8x512xf32>
    %13 = vector.broadcast %4 : vector<1x512xf32> to vector<8x512xf32>
    %14 = arith.addf %12, %13 : vector<8x512xf32>
    %c0_11 = arith.constant 0 : index
    %c0_12 = arith.constant 0 : index
    %15 = vector.load %arg4[%c0_11, %c0_12] : memref<128x512xf32, #tpu.memory_space<vmem>>, vector<128x512xf32>
    %cst = arith.constant dense<0.000000e+00> : vector<8x512xf32>
    %16 = tpu.matmul %5, %15, %cst {dimension_numbers = #tpu.dot_dimension_numbers<[1], [0], [0], [1], [0, 0, 1, 1], [], []>} : vector<8x128xf32>, vector<128x512xf32>, vector<8x512xf32> -> vector<8x512xf32>
    %17 = arith.addf %14, %16 : vector<8x512xf32>
    %18 = vector.extract_strided_slice %17 {offsets = [0, 0], sizes = [8, 128], strides = [1, 1]} : vector<8x512xf32> to vector<8x128xf32>
    %19 = arith.negf %18 : vector<8x128xf32>
    %20 = math.exp %19 : vector<8x128xf32>
    %cst_13 = arith.constant 1.000000e+00 : f32
    %21 = vector.broadcast %cst_13 : f32 to vector<8x128xf32>
    %22 = arith.addf %21, %20 : vector<8x128xf32>
    %23 = arith.divf %21, %22 : vector<8x128xf32>
    %24 = vector.extract_strided_slice %17 {offsets = [0, 128], sizes = [8, 128], strides = [1, 1]} : vector<8x512xf32> to vector<8x128xf32>
    %25 = arith.negf %24 : vector<8x128xf32>
    %26 = math.exp %25 : vector<8x128xf32>
    %cst_14 = arith.constant 1.000000e+00 : f32
    %27 = vector.broadcast %cst_14 : f32 to vector<8x128xf32>
    %28 = arith.addf %27, %26 : vector<8x128xf32>
    %29 = arith.divf %27, %28 : vector<8x128xf32>
    %30 = vector.extract_strided_slice %17 {offsets = [0, 256], sizes = [8, 128], strides = [1, 1]} : vector<8x512xf32> to vector<8x128xf32>
    %31 = math.tanh %30 : vector<8x128xf32>
    %32 = vector.extract_strided_slice %17 {offsets = [0, 384], sizes = [8, 128], strides = [1, 1]} : vector<8x512xf32> to vector<8x128xf32>
    %33 = arith.negf %32 : vector<8x128xf32>
    %34 = math.exp %33 : vector<8x128xf32>
    %cst_15 = arith.constant 1.000000e+00 : f32
    %35 = vector.broadcast %cst_15 : f32 to vector<8x128xf32>
    %36 = arith.addf %35, %34 : vector<8x128xf32>
    %37 = arith.divf %35, %36 : vector<8x128xf32>
    %38 = arith.mulf %29, %6 : vector<8x128xf32>
    %39 = arith.mulf %23, %31 : vector<8x128xf32>
    %40 = arith.addf %38, %39 : vector<8x128xf32>
    %41 = math.tanh %40 : vector<8x128xf32>
    %42 = arith.mulf %37, %41 : vector<8x128xf32>
    %c1_i32 = arith.constant 1 : i32
    %43 = arith.index_cast %c1_i32 : i32 to index
    %c0_16 = arith.constant 0 : index
    %c0_17 = arith.constant 0 : index
    %44 = vector.load %arg2[%43, %c0_16, %c0_17] : memref<8x8x1xf32, #tpu.memory_space<vmem>>, vector<1x8x1xf32>
    %45 = vector.shape_cast %44 : vector<1x8x1xf32> to vector<8x1xf32>
    %46 = vector.broadcast %45 : vector<8x1xf32> to vector<8x512xf32>
    %47 = vector.broadcast %3 : vector<1x512xf32> to vector<8x512xf32>
    %48 = arith.mulf %46, %47 : vector<8x512xf32>
    %49 = vector.broadcast %4 : vector<1x512xf32> to vector<8x512xf32>
    %50 = arith.addf %48, %49 : vector<8x512xf32>
    %c0_18 = arith.constant 0 : index
    %c0_19 = arith.constant 0 : index
    %51 = vector.load %arg4[%c0_18, %c0_19] : memref<128x512xf32, #tpu.memory_space<vmem>>, vector<128x512xf32>
    %cst_20 = arith.constant dense<0.000000e+00> : vector<8x512xf32>
    %52 = tpu.matmul %42, %51, %cst_20 {dimension_numbers = #tpu.dot_dimension_numbers<[1], [0], [0], [1], [0, 0, 1, 1], [], []>} : vector<8x128xf32>, vector<128x512xf32>, vector<8x512xf32> -> vector<8x512xf32>
    %53 = arith.addf %50, %52 : vector<8x512xf32>
    %54 = vector.extract_strided_slice %53 {offsets = [0, 0], sizes = [8, 128], strides = [1, 1]} : vector<8x512xf32> to vector<8x128xf32>
    %55 = arith.negf %54 : vector<8x128xf32>
    %56 = math.exp %55 : vector<8x128xf32>
    %cst_21 = arith.constant 1.000000e+00 : f32
    %57 = vector.broadcast %cst_21 : f32 to vector<8x128xf32>
    %58 = arith.addf %57, %56 : vector<8x128xf32>
    %59 = arith.divf %57, %58 : vector<8x128xf32>
    %60 = vector.extract_strided_slice %53 {offsets = [0, 128], sizes = [8, 128], strides = [1, 1]} : vector<8x512xf32> to vector<8x128xf32>
    %61 = arith.negf %60 : vector<8x128xf32>
    %62 = math.exp %61 : vector<8x128xf32>
    %cst_22 = arith.constant 1.000000e+00 : f32
    %63 = vector.broadcast %cst_22 : f32 to vector<8x128xf32>
    %64 = arith.addf %63, %62 : vector<8x128xf32>
    %65 = arith.divf %63, %64 : vector<8x128xf32>
    %66 = vector.extract_strided_slice %53 {offsets = [0, 256], sizes = [8, 128], strides = [1, 1]} : vector<8x512xf32> to vector<8x128xf32>
    %67 = math.tanh %66 : vector<8x128xf32>
    %68 = vector.extract_strided_slice %53 {offsets = [0, 384], sizes = [8, 128], strides = [1, 1]} : vector<8x512xf32> to vector<8x128xf32>
    %69 = arith.negf %68 : vector<8x128xf32>
    %70 = math.exp %69 : vector<8x128xf32>
    %cst_23 = arith.constant 1.000000e+00 : f32
    %71 = vector.broadcast %cst_23 : f32 to vector<8x128xf32>
    %72 = arith.addf %71, %70 : vector<8x128xf32>
    %73 = arith.divf %71, %72 : vector<8x128xf32>
    %74 = arith.mulf %65, %40 : vector<8x128xf32>
    %75 = arith.mulf %59, %67 : vector<8x128xf32>
    %76 = arith.addf %74, %75 : vector<8x128xf32>
    %77 = math.tanh %76 : vector<8x128xf32>
    %78 = arith.mulf %73, %77 : vector<8x128xf32>
    %c2_i32 = arith.constant 2 : i32
    %79 = arith.index_cast %c2_i32 : i32 to index
    %c0_24 = arith.constant 0 : index
    %c0_25 = arith.constant 0 : index
    %80 = vector.load %arg2[%79, %c0_24, %c0_25] : memref<8x8x1xf32, #tpu.memory_space<vmem>>, vector<1x8x1xf32>
    %81 = vector.shape_cast %80 : vector<1x8x1xf32> to vector<8x1xf32>
    %82 = vector.broadcast %81 : vector<8x1xf32> to vector<8x512xf32>
    %83 = vector.broadcast %3 : vector<1x512xf32> to vector<8x512xf32>
    %84 = arith.mulf %82, %83 : vector<8x512xf32>
    %85 = vector.broadcast %4 : vector<1x512xf32> to vector<8x512xf32>
    %86 = arith.addf %84, %85 : vector<8x512xf32>
    %c0_26 = arith.constant 0 : index
    %c0_27 = arith.constant 0 : index
    %87 = vector.load %arg4[%c0_26, %c0_27] : memref<128x512xf32, #tpu.memory_space<vmem>>, vector<128x512xf32>
    %cst_28 = arith.constant dense<0.000000e+00> : vector<8x512xf32>
    %88 = tpu.matmul %78, %87, %cst_28 {dimension_numbers = #tpu.dot_dimension_numbers<[1], [0], [0], [1], [0, 0, 1, 1], [], []>} : vector<8x128xf32>, vector<128x512xf32>, vector<8x512xf32> -> vector<8x512xf32>
    %89 = arith.addf %86, %88 : vector<8x512xf32>
    %90 = vector.extract_strided_slice %89 {offsets = [0, 0], sizes = [8, 128], strides = [1, 1]} : vector<8x512xf32> to vector<8x128xf32>
    %91 = arith.negf %90 : vector<8x128xf32>
    %92 = math.exp %91 : vector<8x128xf32>
    %cst_29 = arith.constant 1.000000e+00 : f32
    %93 = vector.broadcast %cst_29 : f32 to vector<8x128xf32>
    %94 = arith.addf %93, %92 : vector<8x128xf32>
    %95 = arith.divf %93, %94 : vector<8x128xf32>
    %96 = vector.extract_strided_slice %89 {offsets = [0, 128], sizes = [8, 128], strides = [1, 1]} : vector<8x512xf32> to vector<8x128xf32>
    %97 = arith.negf %96 : vector<8x128xf32>
    %98 = math.exp %97 : vector<8x128xf32>
    %cst_30 = arith.constant 1.000000e+00 : f32
    %99 = vector.broadcast %cst_30 : f32 to vector<8x128xf32>
    %100 = arith.addf %99, %98 : vector<8x128xf32>
    %101 = arith.divf %99, %100 : vector<8x128xf32>
    %102 = vector.extract_strided_slice %89 {offsets = [0, 256], sizes = [8, 128], strides = [1, 1]} : vector<8x512xf32> to vector<8x128xf32>
    %103 = math.tanh %102 : vector<8x128xf32>
    %104 = vector.extract_strided_slice %89 {offsets = [0, 384], sizes = [8, 128], strides = [1, 1]} : vector<8x512xf32> to vector<8x128xf32>
    %105 = arith.negf %104 : vector<8x128xf32>
    %106 = math.exp %105 : vector<8x128xf32>
    %cst_31 = arith.constant 1.000000e+00 : f32
    %107 = vector.broadcast %cst_31 : f32 to vector<8x128xf32>
    %108 = arith.addf %107, %106 : vector<8x128xf32>
    %109 = arith.divf %107, %108 : vector<8x128xf32>
    %110 = arith.mulf %101, %76 : vector<8x128xf32>
    %111 = arith.mulf %95, %103 : vector<8x128xf32>
    %112 = arith.addf %110, %111 : vector<8x128xf32>
    %113 = math.tanh %112 : vector<8x128xf32>
    %114 = arith.mulf %109, %113 : vector<8x128xf32>
    %c3_i32 = arith.constant 3 : i32
    %115 = arith.index_cast %c3_i32 : i32 to index
    %c0_32 = arith.constant 0 : index
    %c0_33 = arith.constant 0 : index
    %116 = vector.load %arg2[%115, %c0_32, %c0_33] : memref<8x8x1xf32, #tpu.memory_space<vmem>>, vector<1x8x1xf32>
    %117 = vector.shape_cast %116 : vector<1x8x1xf32> to vector<8x1xf32>
    %118 = vector.broadcast %117 : vector<8x1xf32> to vector<8x512xf32>
    %119 = vector.broadcast %3 : vector<1x512xf32> to vector<8x512xf32>
    %120 = arith.mulf %118, %119 : vector<8x512xf32>
    %121 = vector.broadcast %4 : vector<1x512xf32> to vector<8x512xf32>
    %122 = arith.addf %120, %121 : vector<8x512xf32>
    %c0_34 = arith.constant 0 : index
    %c0_35 = arith.constant 0 : index
    %123 = vector.load %arg4[%c0_34, %c0_35] : memref<128x512xf32, #tpu.memory_space<vmem>>, vector<128x512xf32>
    %cst_36 = arith.constant dense<0.000000e+00> : vector<8x512xf32>
    %124 = tpu.matmul %114, %123, %cst_36 {dimension_numbers = #tpu.dot_dimension_numbers<[1], [0], [0], [1], [0, 0, 1, 1], [], []>} : vector<8x128xf32>, vector<128x512xf32>, vector<8x512xf32> -> vector<8x512xf32>
    %125 = arith.addf %122, %124 : vector<8x512xf32>
    %126 = vector.extract_strided_slice %125 {offsets = [0, 0], sizes = [8, 128], strides = [1, 1]} : vector<8x512xf32> to vector<8x128xf32>
    %127 = arith.negf %126 : vector<8x128xf32>
    %128 = math.exp %127 : vector<8x128xf32>
    %cst_37 = arith.constant 1.000000e+00 : f32
    %129 = vector.broadcast %cst_37 : f32 to vector<8x128xf32>
    %130 = arith.addf %129, %128 : vector<8x128xf32>
    %131 = arith.divf %129, %130 : vector<8x128xf32>
    %132 = vector.extract_strided_slice %125 {offsets = [0, 128], sizes = [8, 128], strides = [1, 1]} : vector<8x512xf32> to vector<8x128xf32>
    %133 = arith.negf %132 : vector<8x128xf32>
    %134 = math.exp %133 : vector<8x128xf32>
    %cst_38 = arith.constant 1.000000e+00 : f32
    %135 = vector.broadcast %cst_38 : f32 to vector<8x128xf32>
    %136 = arith.addf %135, %134 : vector<8x128xf32>
    %137 = arith.divf %135, %136 : vector<8x128xf32>
    %138 = vector.extract_strided_slice %125 {offsets = [0, 256], sizes = [8, 128], strides = [1, 1]} : vector<8x512xf32> to vector<8x128xf32>
    %139 = math.tanh %138 : vector<8x128xf32>
    %140 = vector.extract_strided_slice %125 {offsets = [0, 384], sizes = [8, 128], strides = [1, 1]} : vector<8x512xf32> to vector<8x128xf32>
    %141 = arith.negf %140 : vector<8x128xf32>
    %142 = math.exp %141 : vector<8x128xf32>
    %cst_39 = arith.constant 1.000000e+00 : f32
    %143 = vector.broadcast %cst_39 : f32 to vector<8x128xf32>
    %144 = arith.addf %143, %142 : vector<8x128xf32>
    %145 = arith.divf %143, %144 : vector<8x128xf32>
    %146 = arith.mulf %137, %112 : vector<8x128xf32>
    %147 = arith.mulf %131, %139 : vector<8x128xf32>
    %148 = arith.addf %146, %147 : vector<8x128xf32>
    %149 = math.tanh %148 : vector<8x128xf32>
    %150 = arith.mulf %145, %149 : vector<8x128xf32>
    %c4_i32 = arith.constant 4 : i32
    %151 = arith.index_cast %c4_i32 : i32 to index
    %c0_40 = arith.constant 0 : index
    %c0_41 = arith.constant 0 : index
    %152 = vector.load %arg2[%151, %c0_40, %c0_41] : memref<8x8x1xf32, #tpu.memory_space<vmem>>, vector<1x8x1xf32>
    %153 = vector.shape_cast %152 : vector<1x8x1xf32> to vector<8x1xf32>
    %154 = vector.broadcast %153 : vector<8x1xf32> to vector<8x512xf32>
    %155 = vector.broadcast %3 : vector<1x512xf32> to vector<8x512xf32>
    %156 = arith.mulf %154, %155 : vector<8x512xf32>
    %157 = vector.broadcast %4 : vector<1x512xf32> to vector<8x512xf32>
    %158 = arith.addf %156, %157 : vector<8x512xf32>
    %c0_42 = arith.constant 0 : index
    %c0_43 = arith.constant 0 : index
    %159 = vector.load %arg4[%c0_42, %c0_43] : memref<128x512xf32, #tpu.memory_space<vmem>>, vector<128x512xf32>
    %cst_44 = arith.constant dense<0.000000e+00> : vector<8x512xf32>
    %160 = tpu.matmul %150, %159, %cst_44 {dimension_numbers = #tpu.dot_dimension_numbers<[1], [0], [0], [1], [0, 0, 1, 1], [], []>} : vector<8x128xf32>, vector<128x512xf32>, vector<8x512xf32> -> vector<8x512xf32>
    %161 = arith.addf %158, %160 : vector<8x512xf32>
    %162 = vector.extract_strided_slice %161 {offsets = [0, 0], sizes = [8, 128], strides = [1, 1]} : vector<8x512xf32> to vector<8x128xf32>
    %163 = arith.negf %162 : vector<8x128xf32>
    %164 = math.exp %163 : vector<8x128xf32>
    %cst_45 = arith.constant 1.000000e+00 : f32
    %165 = vector.broadcast %cst_45 : f32 to vector<8x128xf32>
    %166 = arith.addf %165, %164 : vector<8x128xf32>
    %167 = arith.divf %165, %166 : vector<8x128xf32>
    %168 = vector.extract_strided_slice %161 {offsets = [0, 128], sizes = [8, 128], strides = [1, 1]} : vector<8x512xf32> to vector<8x128xf32>
    %169 = arith.negf %168 : vector<8x128xf32>
    %170 = math.exp %169 : vector<8x128xf32>
    %cst_46 = arith.constant 1.000000e+00 : f32
    %171 = vector.broadcast %cst_46 : f32 to vector<8x128xf32>
    %172 = arith.addf %171, %170 : vector<8x128xf32>
    %173 = arith.divf %171, %172 : vector<8x128xf32>
    %174 = vector.extract_strided_slice %161 {offsets = [0, 256], sizes = [8, 128], strides = [1, 1]} : vector<8x512xf32> to vector<8x128xf32>
    %175 = math.tanh %174 : vector<8x128xf32>
    %176 = vector.extract_strided_slice %161 {offsets = [0, 384], sizes = [8, 128], strides = [1, 1]} : vector<8x512xf32> to vector<8x128xf32>
    %177 = arith.negf %176 : vector<8x128xf32>
    %178 = math.exp %177 : vector<8x128xf32>
    %cst_47 = arith.constant 1.000000e+00 : f32
    %179 = vector.broadcast %cst_47 : f32 to vector<8x128xf32>
    %180 = arith.addf %179, %178 : vector<8x128xf32>
    %181 = arith.divf %179, %180 : vector<8x128xf32>
    %182 = arith.mulf %173, %148 : vector<8x128xf32>
    %183 = arith.mulf %167, %175 : vector<8x128xf32>
    %184 = arith.addf %182, %183 : vector<8x128xf32>
    %185 = math.tanh %184 : vector<8x128xf32>
    %186 = arith.mulf %181, %185 : vector<8x128xf32>
    %c5_i32 = arith.constant 5 : i32
    %187 = arith.index_cast %c5_i32 : i32 to index
    %c0_48 = arith.constant 0 : index
    %c0_49 = arith.constant 0 : index
    %188 = vector.load %arg2[%187, %c0_48, %c0_49] : memref<8x8x1xf32, #tpu.memory_space<vmem>>, vector<1x8x1xf32>
    %189 = vector.shape_cast %188 : vector<1x8x1xf32> to vector<8x1xf32>
    %190 = vector.broadcast %189 : vector<8x1xf32> to vector<8x512xf32>
    %191 = vector.broadcast %3 : vector<1x512xf32> to vector<8x512xf32>
    %192 = arith.mulf %190, %191 : vector<8x512xf32>
    %193 = vector.broadcast %4 : vector<1x512xf32> to vector<8x512xf32>
    %194 = arith.addf %192, %193 : vector<8x512xf32>
    %c0_50 = arith.constant 0 : index
    %c0_51 = arith.constant 0 : index
    %195 = vector.load %arg4[%c0_50, %c0_51] : memref<128x512xf32, #tpu.memory_space<vmem>>, vector<128x512xf32>
    %cst_52 = arith.constant dense<0.000000e+00> : vector<8x512xf32>
    %196 = tpu.matmul %186, %195, %cst_52 {dimension_numbers = #tpu.dot_dimension_numbers<[1], [0], [0], [1], [0, 0, 1, 1], [], []>} : vector<8x128xf32>, vector<128x512xf32>, vector<8x512xf32> -> vector<8x512xf32>
    %197 = arith.addf %194, %196 : vector<8x512xf32>
    %198 = vector.extract_strided_slice %197 {offsets = [0, 0], sizes = [8, 128], strides = [1, 1]} : vector<8x512xf32> to vector<8x128xf32>
    %199 = arith.negf %198 : vector<8x128xf32>
    %200 = math.exp %199 : vector<8x128xf32>
    %cst_53 = arith.constant 1.000000e+00 : f32
    %201 = vector.broadcast %cst_53 : f32 to vector<8x128xf32>
    %202 = arith.addf %201, %200 : vector<8x128xf32>
    %203 = arith.divf %201, %202 : vector<8x128xf32>
    %204 = vector.extract_strided_slice %197 {offsets = [0, 128], sizes = [8, 128], strides = [1, 1]} : vector<8x512xf32> to vector<8x128xf32>
    %205 = arith.negf %204 : vector<8x128xf32>
    %206 = math.exp %205 : vector<8x128xf32>
    %cst_54 = arith.constant 1.000000e+00 : f32
    %207 = vector.broadcast %cst_54 : f32 to vector<8x128xf32>
    %208 = arith.addf %207, %206 : vector<8x128xf32>
    %209 = arith.divf %207, %208 : vector<8x128xf32>
    %210 = vector.extract_strided_slice %197 {offsets = [0, 256], sizes = [8, 128], strides = [1, 1]} : vector<8x512xf32> to vector<8x128xf32>
    %211 = math.tanh %210 : vector<8x128xf32>
    %212 = vector.extract_strided_slice %197 {offsets = [0, 384], sizes = [8, 128], strides = [1, 1]} : vector<8x512xf32> to vector<8x128xf32>
    %213 = arith.negf %212 : vector<8x128xf32>
    %214 = math.exp %213 : vector<8x128xf32>
    %cst_55 = arith.constant 1.000000e+00 : f32
    %215 = vector.broadcast %cst_55 : f32 to vector<8x128xf32>
    %216 = arith.addf %215, %214 : vector<8x128xf32>
    %217 = arith.divf %215, %216 : vector<8x128xf32>
    %218 = arith.mulf %209, %184 : vector<8x128xf32>
    %219 = arith.mulf %203, %211 : vector<8x128xf32>
    %220 = arith.addf %218, %219 : vector<8x128xf32>
    %221 = math.tanh %220 : vector<8x128xf32>
    %222 = arith.mulf %217, %221 : vector<8x128xf32>
    %c6_i32 = arith.constant 6 : i32
    %223 = arith.index_cast %c6_i32 : i32 to index
    %c0_56 = arith.constant 0 : index
    %c0_57 = arith.constant 0 : index
    %224 = vector.load %arg2[%223, %c0_56, %c0_57] : memref<8x8x1xf32, #tpu.memory_space<vmem>>, vector<1x8x1xf32>
    %225 = vector.shape_cast %224 : vector<1x8x1xf32> to vector<8x1xf32>
    %226 = vector.broadcast %225 : vector<8x1xf32> to vector<8x512xf32>
    %227 = vector.broadcast %3 : vector<1x512xf32> to vector<8x512xf32>
    %228 = arith.mulf %226, %227 : vector<8x512xf32>
    %229 = vector.broadcast %4 : vector<1x512xf32> to vector<8x512xf32>
    %230 = arith.addf %228, %229 : vector<8x512xf32>
    %c0_58 = arith.constant 0 : index
    %c0_59 = arith.constant 0 : index
    %231 = vector.load %arg4[%c0_58, %c0_59] : memref<128x512xf32, #tpu.memory_space<vmem>>, vector<128x512xf32>
    %cst_60 = arith.constant dense<0.000000e+00> : vector<8x512xf32>
    %232 = tpu.matmul %222, %231, %cst_60 {dimension_numbers = #tpu.dot_dimension_numbers<[1], [0], [0], [1], [0, 0, 1, 1], [], []>} : vector<8x128xf32>, vector<128x512xf32>, vector<8x512xf32> -> vector<8x512xf32>
    %233 = arith.addf %230, %232 : vector<8x512xf32>
    %234 = vector.extract_strided_slice %233 {offsets = [0, 0], sizes = [8, 128], strides = [1, 1]} : vector<8x512xf32> to vector<8x128xf32>
    %235 = arith.negf %234 : vector<8x128xf32>
    %236 = math.exp %235 : vector<8x128xf32>
    %cst_61 = arith.constant 1.000000e+00 : f32
    %237 = vector.broadcast %cst_61 : f32 to vector<8x128xf32>
    %238 = arith.addf %237, %236 : vector<8x128xf32>
    %239 = arith.divf %237, %238 : vector<8x128xf32>
    %240 = vector.extract_strided_slice %233 {offsets = [0, 128], sizes = [8, 128], strides = [1, 1]} : vector<8x512xf32> to vector<8x128xf32>
    %241 = arith.negf %240 : vector<8x128xf32>
    %242 = math.exp %241 : vector<8x128xf32>
    %cst_62 = arith.constant 1.000000e+00 : f32
    %243 = vector.broadcast %cst_62 : f32 to vector<8x128xf32>
    %244 = arith.addf %243, %242 : vector<8x128xf32>
    %245 = arith.divf %243, %244 : vector<8x128xf32>
    %246 = vector.extract_strided_slice %233 {offsets = [0, 256], sizes = [8, 128], strides = [1, 1]} : vector<8x512xf32> to vector<8x128xf32>
    %247 = math.tanh %246 : vector<8x128xf32>
    %248 = vector.extract_strided_slice %233 {offsets = [0, 384], sizes = [8, 128], strides = [1, 1]} : vector<8x512xf32> to vector<8x128xf32>
    %249 = arith.negf %248 : vector<8x128xf32>
    %250 = math.exp %249 : vector<8x128xf32>
    %cst_63 = arith.constant 1.000000e+00 : f32
    %251 = vector.broadcast %cst_63 : f32 to vector<8x128xf32>
    %252 = arith.addf %251, %250 : vector<8x128xf32>
    %253 = arith.divf %251, %252 : vector<8x128xf32>
    %254 = arith.mulf %245, %220 : vector<8x128xf32>
    %255 = arith.mulf %239, %247 : vector<8x128xf32>
    %256 = arith.addf %254, %255 : vector<8x128xf32>
    %257 = math.tanh %256 : vector<8x128xf32>
    %258 = arith.mulf %253, %257 : vector<8x128xf32>
    %c7_i32 = arith.constant 7 : i32
    %259 = arith.index_cast %c7_i32 : i32 to index
    %c0_64 = arith.constant 0 : index
    %c0_65 = arith.constant 0 : index
    %260 = vector.load %arg2[%259, %c0_64, %c0_65] : memref<8x8x1xf32, #tpu.memory_space<vmem>>, vector<1x8x1xf32>
    %261 = vector.shape_cast %260 : vector<1x8x1xf32> to vector<8x1xf32>
    %262 = vector.broadcast %261 : vector<8x1xf32> to vector<8x512xf32>
    %263 = vector.broadcast %3 : vector<1x512xf32> to vector<8x512xf32>
    %264 = arith.mulf %262, %263 : vector<8x512xf32>
    %265 = vector.broadcast %4 : vector<1x512xf32> to vector<8x512xf32>
    %266 = arith.addf %264, %265 : vector<8x512xf32>
    %c0_66 = arith.constant 0 : index
    %c0_67 = arith.constant 0 : index
    %267 = vector.load %arg4[%c0_66, %c0_67] : memref<128x512xf32, #tpu.memory_space<vmem>>, vector<128x512xf32>
    %cst_68 = arith.constant dense<0.000000e+00> : vector<8x512xf32>
    %268 = tpu.matmul %258, %267, %cst_68 {dimension_numbers = #tpu.dot_dimension_numbers<[1], [0], [0], [1], [0, 0, 1, 1], [], []>} : vector<8x128xf32>, vector<128x512xf32>, vector<8x512xf32> -> vector<8x512xf32>
    %269 = arith.addf %266, %268 : vector<8x512xf32>
    %270 = vector.extract_strided_slice %269 {offsets = [0, 0], sizes = [8, 128], strides = [1, 1]} : vector<8x512xf32> to vector<8x128xf32>
    %271 = arith.negf %270 : vector<8x128xf32>
    %272 = math.exp %271 : vector<8x128xf32>
    %cst_69 = arith.constant 1.000000e+00 : f32
    %273 = vector.broadcast %cst_69 : f32 to vector<8x128xf32>
    %274 = arith.addf %273, %272 : vector<8x128xf32>
    %275 = arith.divf %273, %274 : vector<8x128xf32>
    %276 = vector.extract_strided_slice %269 {offsets = [0, 128], sizes = [8, 128], strides = [1, 1]} : vector<8x512xf32> to vector<8x128xf32>
    %277 = arith.negf %276 : vector<8x128xf32>
    %278 = math.exp %277 : vector<8x128xf32>
    %cst_70 = arith.constant 1.000000e+00 : f32
    %279 = vector.broadcast %cst_70 : f32 to vector<8x128xf32>
    %280 = arith.addf %279, %278 : vector<8x128xf32>
    %281 = arith.divf %279, %280 : vector<8x128xf32>
    %282 = vector.extract_strided_slice %269 {offsets = [0, 256], sizes = [8, 128], strides = [1, 1]} : vector<8x512xf32> to vector<8x128xf32>
    %283 = math.tanh %282 : vector<8x128xf32>
    %284 = vector.extract_strided_slice %269 {offsets = [0, 384], sizes = [8, 128], strides = [1, 1]} : vector<8x512xf32> to vector<8x128xf32>
    %285 = arith.negf %284 : vector<8x128xf32>
    %286 = math.exp %285 : vector<8x128xf32>
    %cst_71 = arith.constant 1.000000e+00 : f32
    %287 = vector.broadcast %cst_71 : f32 to vector<8x128xf32>
    %288 = arith.addf %287, %286 : vector<8x128xf32>
    %289 = arith.divf %287, %288 : vector<8x128xf32>
    %290 = arith.mulf %281, %256 : vector<8x128xf32>
    %291 = arith.mulf %275, %283 : vector<8x128xf32>
    %292 = arith.addf %290, %291 : vector<8x128xf32>
    %293 = math.tanh %292 : vector<8x128xf32>
    %294 = arith.mulf %289, %293 : vector<8x128xf32>
    %c8_i32 = arith.constant 8 : i32
    %c0_72 = arith.constant 0 : index
    %c0_73 = arith.constant 0 : index
    %295 = vector.load %arg9[%c0_72, %c0_73] : memref<8x128xf32, #tpu.memory_space<vmem>>, vector<8x128xf32>
    tpu.vector_store %arg9[%c0_72, %c0_73], %294 {strides = array<i32>} : memref<8x128xf32, #tpu.memory_space<vmem>>, vector<8x128xf32>,
    %c0_74 = arith.constant 0 : index
    %c0_75 = arith.constant 0 : index
    %296 = vector.load %arg10[%c0_74, %c0_75] : memref<8x128xf32, #tpu.memory_space<vmem>>, vector<8x128xf32>
    tpu.vector_store %arg10[%c0_74, %c0_75], %292 {strides = array<i32>} : memref<8x128xf32, #tpu.memory_space<vmem>>, vector<8x128xf32>,
    %c0_i32_76 = arith.constant 0 : i32
    %297 = arith.cmpi eq, %arg1, %c0_i32_76 : i32
    %298 = arith.extui %297 : i1 to i32
    %c0_i32_77 = arith.constant 0 : i32
    %299 = arith.cmpi ne, %298, %c0_i32_77 : i32
    scf.if %299 {
      %c0_78 = arith.constant 0 : index
      %c0_79 = arith.constant 0 : index
      %300 = vector.load %arg6[%c0_78, %c0_79] : memref<1x128xf32, #tpu.memory_space<vmem>>, vector<1x128xf32>
      %301 = vector.broadcast %300 : vector<1x128xf32> to vector<8x128xf32>
      %302 = arith.mulf %294, %301 : vector<8x128xf32>
      %cst_80 = arith.constant dense<0.000000e+00> : vector<8xf32>
      %303 = vector.multi_reduction <add>, %302, %cst_80 [1] : vector<8x128xf32> to vector<8xf32>
      %304 = vector.shape_cast %303 : vector<8xf32> to vector<8x1xf32>
      %c0_81 = arith.constant 0 : index
      %c0_82 = arith.constant 0 : index
      %305 = vector.load %arg7[%c0_81, %c0_82] : memref<1x1xf32, #tpu.memory_space<vmem>>, vector<1x1xf32>
      %306 = vector.broadcast %305 : vector<1x1xf32> to vector<8x1xf32>
      %307 = arith.addf %304, %306 : vector<8x1xf32>
      %c0_83 = arith.constant 0 : index
      %c0_84 = arith.constant 0 : index
      %308 = vector.load %arg8[%c0_83, %c0_84] : memref<8x1xf32, #tpu.memory_space<vmem>>, vector<8x1xf32>
      tpu.vector_store %arg8[%c0_83, %c0_84], %307 {strides = array<i32>} : memref<8x1xf32, #tpu.memory_space<vmem>>, vector<8x1xf32>,
    } else {
    }
    return
  }
  func.func @transform_0(%arg0: i32, %arg1: i32) -> (i32, i32, i32) {
    %c0_i32 = arith.constant 0 : i32
    %c0_i32_0 = arith.constant 0 : i32
    return %arg1, %arg0, %c0_i32 : i32, i32, i32
  }
  func.func @transform_1(%arg0: i32, %arg1: i32) -> (i32, i32) {
    %c0_i32 = arith.constant 0 : i32
    %c0_i32_0 = arith.constant 0 : i32
    %c0_i32_1 = arith.constant 0 : i32
    return %c0_i32, %c0_i32_0 : i32, i32
  }
  func.func @transform_2(%arg0: i32, %arg1: i32) -> (i32, i32) {
    %c0_i32 = arith.constant 0 : i32
    %c0_i32_0 = arith.constant 0 : i32
    %c0_i32_1 = arith.constant 0 : i32
    return %c0_i32, %c0_i32_0 : i32, i32
  }
  func.func @transform_3(%arg0: i32, %arg1: i32) -> (i32, i32) {
    %c0_i32 = arith.constant 0 : i32
    %c0_i32_0 = arith.constant 0 : i32
    %c0_i32_1 = arith.constant 0 : i32
    return %c0_i32, %c0_i32_0 : i32, i32
  }
  func.func @transform_4(%arg0: i32, %arg1: i32) -> (i32, i32) {
    %c0_i32 = arith.constant 0 : i32
    %c0_i32_0 = arith.constant 0 : i32
    %c0_i32_1 = arith.constant 0 : i32
    return %c0_i32, %c0_i32_0 : i32, i32
  }
  func.func @transform_5(%arg0: i32, %arg1: i32) -> (i32, i32) {
    %c0_i32 = arith.constant 0 : i32
    %c0_i32_0 = arith.constant 0 : i32
    %c0_i32_1 = arith.constant 0 : i32
    return %c0_i32, %c0_i32_0 : i32, i32
  }
  func.func @transform_6(%arg0: i32, %arg1: i32) -> (i32, i32) {
    %c0_i32 = arith.constant 0 : i32
    %c0_i32_0 = arith.constant 0 : i32
    return %arg0, %c0_i32 : i32, i32
  }
}

</mosaic_0001>

<bundles_post_ra>
// kernel: lstm_model_forward.1
= control target key start
LH: loop header
LB: loop body
LE: loop exit
PB: predicated region body
PF: predicated region fallthrough
CT: control target
= control target key end

     0   :  { %v2326_v3 = vmov 0.0   ;;  %v2327_v8 = vmov 0   ;;  %vm1643_vm0 = vcmask 7168   ;;  %s3036_s2 = inlined_call_operand.vmem [shape: f32[128,512], index: 2, kind: input, shape index: {}]   ;;  %s3037_s0 = inlined_call_operand.vmem [shape: f32[8,8,1], index: 0, kind: input, shape index: {}]   ;;  %s3038_s1 = inlined_call_operand.vmem [shape: f32[1,512], index: 1, kind: input, shape index: {}]   ;;  %s3039_s3 = inlined_call_operand.vmem [shape: f32[1,512], index: 3, kind: input, shape index: {}]   ;;  %s3040_s5 = inlined_call_operand.<no memory space> [shape: f32[1,1], index: 5, kind: input, shape index: {}]   ;;  %s3041_s4 = inlined_call_operand.vmem [shape: f32[1,128], index: 4, kind: input, shape index: {}]   ;;  %s3042_s6 = inlined_call_operand.vmem [shape: f32[8,1], index: 6, kind: output, shape index: {}]  }
   0x1   :  { %v92_v0 = vld [vmem:[%s3036_s2 + $0x8] sm:$0xff]  ;;  %v94_v2 = vld [vmem:[%s3036_s2 + $0x18] sm:$0xff]  ;;  %219 = vmatprep.mubr.f32.mxu0 %v2326_v3  ;;  %290 = vmatprep.mubr.f32.mxu1 %v2326_v3  ;;  %v91_v6 = vld [vmem:[%s3036_s2] sm:$0xff] }
   0x2   :  { %v96_v1 = vld [vmem:[%s3036_s2 + $0x28] sm:$0xff]  ;;  %v98_v5 = vld [vmem:[%s3036_s2 + $0x38] sm:$0xff]  ;;  %v95_v7 = vld [vmem:[%s3036_s2 + $0x20] sm:$0xff]  ;;  %2196 = vset.pattern.permute.xlu0 %v2327_v8  ;;  %2197 = vset.pattern.permute.xlu1 %v2327_v8 }
   0x3   :  { %v2374_v4 = vpack.c.bf16 %v96_v1, %v92_v0  ;;  %v2385_v9 = vpack.c.bf16 %v98_v5, %v94_v2  ;;  %v2387_v10 = vpack.c.bf16 %v95_v7, %v91_v6  ;;  %v93_v11 = vld [vmem:[%s3036_s2 + $0x10] sm:$0xff]  ;;  %v100_v13 = vld [vmem:[%s3036_s2 + $0x48] sm:$0xff]  ;;  %v102_v16 = vld [vmem:[%s3036_s2 + $0x58] sm:$0xff] }
   0x4   :  { %v97_v12 = vld [vmem:[%s3036_s2 + $0x30] sm:$0xff]  ;;  %v104_v15 = vld [vmem:[%s3036_s2 + $0x68] sm:$0xff]  ;;  %v106_v17 = vld [vmem:[%s3036_s2 + $0x78] sm:$0xff] }
   0x5   :  { %1683 = vmatprep.subr.bf16.mxu0 %v2374_v4  ;;  %v2399_v14 = vpack.c.bf16 %v97_v12, %v93_v11  ;;  %1715 = vmatprep.subr.bf16.mxu1 %v2385_v9  ;;  %v2412_v18 = vpack.c.bf16 %v104_v15, %v100_v13  ;;  %v2414_v19 = vpack.c.bf16 %v106_v17, %v102_v16  ;;  %v99_v20 = vld [vmem:[%s3036_s2 + $0x40] sm:$0xff]  ;;  %v101_v22 = vld [vmem:[%s3036_s2 + $0x50] sm:$0xff]  ;;  %v108_v25 = vld [vmem:[%s3036_s2 + $0x88] sm:$0xff] }
   0x6   :  { %1685 = vmatpush1.bf16.msra.mxu0 %v2387_v10  ;;  %v103_v21 = vld [vmem:[%s3036_s2 + $0x60] sm:$0xff]  ;;  %v105_v24 = vld [vmem:[%s3036_s2 + $0x70] sm:$0xff]  ;;  %v112_v26 = vld [vmem:[%s3036_s2 + $0xa8] sm:$0xff] }
   0x7   :  { %1717 = vmatpush1.bf16.msra.mxu1 %v2399_v14  ;;  %v2426_v23 = vpack.c.bf16 %v103_v21, %v99_v20  ;;  %1687 = vmatprep.subr.bf16.mxu0 %v2412_v18  ;;  %v2439_v27 = vpack.c.bf16 %v105_v24, %v101_v22  ;;  %v2441_v28 = vpack.c.bf16 %v112_v26, %v108_v25  ;;  %v110_v29 = vld [vmem:[%s3036_s2 + $0x98] sm:$0xff]  ;;  %v107_v31 = vld [vmem:[%s3036_s2 + $0x80] sm:$0xff]  ;;  %v109_v34 = vld [vmem:[%s3036_s2 + $0x90] sm:$0xff] }
   0x8   :  { %1719 = vmatprep.subr.bf16.mxu1 %v2414_v19  ;;  %v114_v30 = vld [vmem:[%s3036_s2 + $0xb8] sm:$0xff]  ;;  %v111_v33 = vld [vmem:[%s3036_s2 + $0xa0] sm:$0xff]  ;;  %v113_v35 = vld [vmem:[%s3036_s2 + $0xb0] sm:$0xff] }
   0x9   :  { %v2452_v32 = vpack.c.bf16 %v114_v30, %v110_v29  ;;  %v2464_v36 = vpack.c.bf16 %v111_v33, %v107_v31  ;;  %v116_v37 = vld [vmem:[%s3036_s2 + $0xc8] sm:$0xff]  ;;  %v118_v39 = vld [vmem:[%s3036_s2 + $0xd8] sm:$0xff]  ;;  %v2477_v40 = vpack.c.bf16 %v113_v35, %v109_v34  ;;  %v115_v43 = vld [vmem:[%s3036_s2 + $0xc0] sm:$0xff] }
   0xa   :  { %1689 = vmatpush1.bf16.msra.mxu0 %v2426_v23  ;;  %v120_v38 = vld [vmem:[%s3036_s2 + $0xe8] sm:$0xff]  ;;  %v122_v42 = vld [vmem:[%s3036_s2 + $0xf8] sm:$0xff]  ;;  %v119_v44 = vld [vmem:[%s3036_s2 + $0xe0] sm:$0xff] }
   0xb   :  { %1721 = vmatpush1.bf16.msra.mxu1 %v2439_v27  ;;  %1691 = vmatprep.subr.bf16.mxu0 %v2441_v28  ;;  %v2479_v41 = vpack.c.bf16 %v120_v38, %v116_v37  ;;  %v2491_v45 = vpack.c.bf16 %v122_v42, %v118_v39  ;;  %v117_v46 = vld [vmem:[%s3036_s2 + $0xd0] sm:$0xff]  ;;  %v124_v48 = vld [vmem:[%s3036_s2 + $0x108] sm:$0xff]  ;;  %v126_v50 = vld [vmem:[%s3036_s2 + $0x118] sm:$0xff]  ;;  %v2512_v52 = vpack.c.bf16 %v119_v44, %v115_v43 }
   0xc   :  { %1723 = vmatprep.subr.bf16.mxu1 %v2452_v32  ;;  %v121_v47 = vld [vmem:[%s3036_s2 + $0xf0] sm:$0xff]  ;;  %v128_v49 = vld [vmem:[%s3036_s2 + $0x128] sm:$0xff]  ;;  %v130_v51 = vld [vmem:[%s3036_s2 + $0x138] sm:$0xff] }
   0xd   :  { %v2516_v53 = vpack.c.bf16 %v121_v47, %v117_v46  ;;  %v2518_v54 = vpack.c.bf16 %v128_v49, %v124_v48  ;;  %v123_v55 = vld [vmem:[%s3036_s2 + $0x100] sm:$0xff]  ;;  %v125_v57 = vld [vmem:[%s3036_s2 + $0x110] sm:$0xff]  ;;  %v2530_v58 = vpack.c.bf16 %v130_v51, %v126_v50  ;;  %v132_v60 = vld [vmem:[%s3036_s2 + $0x148] sm:$0xff] }
   0xe   :  { %1693 = vmatpush1.bf16.msra.mxu0 %v2464_v36  ;;  %v127_v56 = vld [vmem:[%s3036_s2 + $0x120] sm:$0xff]  ;;  %v129_v59 = vld [vmem:[%s3036_s2 + $0x130] sm:$0xff]  ;;  %v136_v61 = vld [vmem:[%s3036_s2 + $0x168] sm:$0xff] }
   0xf   :  { %1725 = vmatpush1.bf16.msra.mxu1 %v2477_v40  ;;  %1695 = vmatprep.subr.bf16.mxu0 %v2479_v41  ;;  %v134_v62 = vld [vmem:[%s3036_s2 + $0x158] sm:$0xff]  ;;  %v2548_v0 = vpack.c.bf16 %v127_v56, %v123_v55  ;;  %v2552_v1 = vpack.c.bf16 %v129_v59, %v125_v57  ;;  %v2554_v2 = vpack.c.bf16 %v136_v61, %v132_v60  ;;  %v131_v5 = vld [vmem:[%s3036_s2 + $0x140] sm:$0xff]  ;;  %v133_v7 = vld [vmem:[%s3036_s2 + $0x150] sm:$0xff]  ;;  %v42_v56 = vlaneseq }
  0x10   :  { %1727 = vmatprep.subr.bf16.mxu1 %v2491_v45  ;;  %v138_v63 = vld [vmem:[%s3036_s2 + $0x178] sm:$0xff]  ;;  %v135_v6 = vld [vmem:[%s3036_s2 + $0x160] sm:$0xff]  ;;  %v137_v11 = vld [vmem:[%s3036_s2 + $0x170] sm:$0xff] }
  0x11   :  { %v2566_v8 = vpack.c.bf16 %v138_v63, %v134_v62  ;;  %v140_v12 = vld [vmem:[%s3036_s2 + $0x188] sm:$0xff]  ;;  %v142_v15 = vld [vmem:[%s3036_s2 + $0x198] sm:$0xff]  ;;  %v2584_v17 = vpack.c.bf16 %v135_v6, %v131_v5  ;;  %v139_v20 = vld [vmem:[%s3036_s2 + $0x180] sm:$0xff]  ;;  %v2591_v21 = vpack.c.bf16 %v137_v11, %v133_v7  ;;  %v43_v57 = vshrl.u32 %v42_v56, 7 }
  0x12   :  { %1697 = vmatpush1.bf16.msra.mxu0 %v2512_v52  ;;  %v144_v13 = vld [vmem:[%s3036_s2 + $0x1a8] sm:$0xff]  ;;  %v146_v16 = vld [vmem:[%s3036_s2 + $0x1b8] sm:$0xff]  ;;  %v143_v24 = vld [vmem:[%s3036_s2 + $0x1a0] sm:$0xff] }
  0x13   :  { %1729 = vmatpush1.bf16.msra.mxu1 %v2516_v53  ;;  %1699 = vmatprep.subr.bf16.mxu0 %v2518_v54  ;;  %v2593_v22 = vpack.c.bf16 %v144_v13, %v140_v12  ;;  %v141_v25 = vld [vmem:[%s3036_s2 + $0x190] sm:$0xff]  ;;  %v35_v26 = vld [vmem:[%s3037_s0] sm:$0xff]  ;;  %v2605_v29 = vpack.c.bf16 %v146_v16, %v142_v15  ;;  %v148_v31 = vld [vmem:[%s3036_s2 + $0x1c8] sm:$0xff]  ;;  %v2626_v38 = vpack.c.bf16 %v143_v24, %v139_v20  ;;  %v44_v59 = vsub.s32 0, %v43_v57 }
  0x14   :  { %1731 = vmatprep.subr.bf16.mxu1 %v2530_v58  ;;  %v145_v30 = vld [vmem:[%s3036_s2 + $0x1b0] sm:$0xff]  ;;  %v152_v33 = vld [vmem:[%s3036_s2 + $0x1e8] sm:$0xff]  ;;  %38 = vperm.xlu0 %2196, %v35_v26   ;;  %v150_v34 = vld [vmem:[%s3036_s2 + $0x1d8] sm:$0xff]  ;;  %v48_v61 = vsub.s32 1, %v43_v57  ;;  %v56_v7 = vsub.s32 3, %v43_v57  ;;  %v52_v24 = vsub.s32 2, %v43_v57 }
  0x15   :  { %v154_v35 = vld [vmem:[%s3036_s2 + $0x1f8] sm:$0xff]  ;;  %v1652_v37 = vld [vmem:[%s3037_s0 + $0x8] sm:$0xff]  ;;  %v2630_v39 = vpack.c.bf16 %v145_v30, %v141_v25  ;;  %v2632_v42 = vpack.c.bf16 %v152_v33, %v148_v31  ;;  %v147_v43 = vld [vmem:[%s3036_s2 + $0x1c0] sm:$0xff] }
  0x16   :  { %1701 = vmatpush1.bf16.msra.mxu0 %v2548_v0  ;;  %v151_v44 = vld [vmem:[%s3036_s2 + $0x1e0] sm:$0xff]  ;;  %v2641_v46 = vpack.c.bf16 %v154_v35, %v150_v34  ;;  %v149_v47 = vld [vmem:[%s3036_s2 + $0x1d0] sm:$0xff] }
  0x17   :  { %1733 = vmatpush1.bf16.msra.mxu1 %v2552_v1  ;;  %1703 = vmatprep.subr.bf16.mxu0 %v2554_v2  ;;  %v153_v48 = vld [vmem:[%s3036_s2 + $0x1f0] sm:$0xff]  ;;  %v1664_v49 = vld [vmem:[%s3037_s0 + $0x20] sm:$0xff]  ;;  %v2653_v50 = vpack.c.bf16 %v151_v44, %v147_v43 }
  0x18   :  { %1735 = vmatprep.subr.bf16.mxu1 %v2566_v8  ;;  %329 = vperm.xlu0 %2196, %v1652_v37   ;;  %v2657_v51 = vpack.c.bf16 %v153_v48, %v149_v47  ;;  %v1672_v55 = vld [vmem:[%s3037_s0 + $0x30] sm:$0xff]  ;;  %v31_v60 = vld [vmem:[%s3038_s1] sm:$0xf] }
  0x19   :  { %v2706_v62 = vrot.slane %v31_v60, %v44_v59  ;;  %v32_v63 = vld [vmem:[%s3039_s3] sm:$0xf]  ;;  %v2711_v5 = vrot.slane %v31_v60, %v48_v61  ;;  %v2719_v16 = vrot.slane %v31_v60, %v56_v7  ;;  %v2726_v34 = vrot.slane %v31_v60, %v52_v24 }
  0x1a   :  { %1705 = vmatpush1.bf16.msra.mxu0 %v2584_v17  ;;  %v2714_v12 = vrot.slane %v32_v63, %v44_v59  ;;  %v2717_v15 = vrot.slane %v32_v63, %v48_v61  ;;  %v2724_v31 = vrot.slane %v32_v63, %v56_v7  ;;  %v2730_v56 = vrot.slane %v32_v63, %v52_v24 }
  0x1b   :  { %1737 = vmatpush1.bf16.msra.mxu1 %v2591_v21  ;;  %1707 = vmatprep.subr.bf16.mxu0 %v2593_v22 }
  0x1c   :  { %1739 = vmatprep.subr.bf16.mxu1 %v2605_v29  ;;  %884 = vperm.xlu0 %2196, %v1664_v49  }
  0x1e   :  { %1709 = vmatpush1.bf16.msra.mxu0 %v2626_v38 }
  0x1f   :  { %1741 = vmatpush1.bf16.msra.mxu1 %v2630_v39  ;;  %1711 = vmatprep.subr.bf16.mxu0 %v2632_v42 }
  0x20   :  { %1743 = vmatprep.subr.bf16.mxu1 %v2641_v46  ;;  %1254 = vperm.xlu0 %2196, %v1672_v55  }
  0x22   :  { %1713 = vmatpush1.bf16.msra.mxu0 %v2653_v50 }
  0x23   :  { %1745 = vmatpush1.bf16.msra.mxu1 %v2657_v51  ;;  %1747 = vmatprep.subr.bf16.mxu0 %v2374_v4 }
  0x24   :  { %1779 = vmatprep.subr.bf16.mxu1 %v2385_v9 }
  0x25   :  { %220 = vmatmul.mubr.f32.vlgmr.msra.gmra.mrb[0].mxu0 %v2326_v3 }
  0x26   :  { %291 = vmatmul.mubr.f32.vlgmr.msra.gmra.mrb[0].mxu1 %v2326_v3  ;;  %1749 = vmatpush1.bf16.msra.mxu0 %v2387_v10 }
  0x27   :  { %1781 = vmatpush1.bf16.msra.mxu1 %v2399_v14  ;;  %1751 = vmatprep.subr.bf16.mxu0 %v2412_v18 }
  0x28   :  { %1783 = vmatprep.subr.bf16.mxu1 %v2414_v19  ;;  %404 = vmatprep.mubr.f32.mxu0 %v2326_v3 }
  0x29   :  { %475 = vmatprep.mubr.f32.mxu1 %v2326_v3 }
  0x2a   :  { %1753 = vmatpush1.bf16.msra.mxu0 %v2426_v23 }
  0x2b   :  { %1785 = vmatpush1.bf16.msra.mxu1 %v2439_v27  ;;  %1755 = vmatprep.subr.bf16.mxu0 %v2441_v28 }
  0x2c   :  { %1787 = vmatprep.subr.bf16.mxu1 %v2452_v32 }
  0x2e   :  { %1757 = vmatpush1.bf16.msra.mxu0 %v2464_v36 }
  0x2f   :  { %1789 = vmatpush1.bf16.msra.mxu1 %v2477_v40  ;;  %1759 = vmatprep.subr.bf16.mxu0 %v2479_v41 }
  0x30   :  { %1791 = vmatprep.subr.bf16.mxu1 %v2491_v45 }
  0x32   :  { %1761 = vmatpush1.bf16.msra.mxu0 %v2512_v52 }
  0x33   :  { %1793 = vmatpush1.bf16.msra.mxu1 %v2516_v53  ;;  %1763 = vmatprep.subr.bf16.mxu0 %v2518_v54 }
  0x34   :  { %1795 = vmatprep.subr.bf16.mxu1 %v2530_v58 }
  0x36   :  { %1765 = vmatpush1.bf16.msra.mxu0 %v2548_v0 }
  0x37   :  { %1797 = vmatpush1.bf16.msra.mxu1 %v2552_v1  ;;  %1767 = vmatprep.subr.bf16.mxu0 %v2554_v2 }
  0x38   :  { %1799 = vmatprep.subr.bf16.mxu1 %v2566_v8 }
  0x3a   :  { %1769 = vmatpush1.bf16.msra.mxu0 %v2584_v17 }
  0x3b   :  { %1801 = vmatpush1.bf16.msra.mxu1 %v2591_v21  ;;  %1771 = vmatprep.subr.bf16.mxu0 %v2593_v22 }
  0x3c   :  { %1803 = vmatprep.subr.bf16.mxu1 %v2605_v29 }
  0x3e   :  { %1773 = vmatpush1.bf16.msra.mxu0 %v2626_v38 }
  0x3f   :  { %1805 = vmatpush1.bf16.msra.mxu1 %v2630_v39  ;;  %1775 = vmatprep.subr.bf16.mxu0 %v2632_v42 }
  0x40   :  { %1807 = vmatprep.subr.bf16.mxu1 %v2641_v46 }
  0x42   :  { %1777 = vmatpush1.bf16.msra.mxu0 %v2653_v50 }
  0x43   :  { %1809 = vmatpush1.bf16.msra.mxu1 %v2657_v51  ;;  %1811 = vmatprep.subr.bf16.mxu0 %v2374_v4 }
  0x44   :  { %1843 = vmatprep.subr.bf16.mxu1 %v2385_v9 }
  0x93   :  { %v39_v6 = vpop.permute.xlu0 %38 }
  0x94   :  { %v62_v11 = vmul.f32 %v2706_v62, %v39_v6  ;;  %v63_v13 = vmul.f32 %v2711_v5, %v39_v6  ;;  %v65_v30 = vmul.f32 %v2719_v16, %v39_v6  ;;  %v64_v55 = vmul.f32 %v2726_v34, %v39_v6 }
  0x96   :  { %v87_v20 = vadd.f32 %v2714_v12, %v62_v11  ;;  %v88_v25 = vadd.f32 %v2717_v15, %v63_v13  ;;  %v90_v49 = vadd.f32 %v2724_v31, %v65_v30  ;;  %v89_v59 = vadd.f32 %v2730_v56, %v64_v55  ;;  %v1676_v55 = vld [vmem:[%s3037_s0 + $0x38] sm:$0xff] }
  0xf8   :  { %v221_v26 = vpop.f32.mrb[0].mxu0 }
  0xf9   :  { %v297_v33 = vadd.f32 %v221_v26, %v87_v20  ;;  %v292_v35 = vpop.f32.mrb[0].mxu1  ;;  %v223_v37 = vpop.f32.mrb[1].mxu0 }
  0xfa   :  { %v298_v43 = vadd.f32 %v223_v37, %v88_v25  ;;  %v294_v44 = vpop.f32.mrb[1].mxu1  ;;  %v299_v60 = vadd.f32 %v292_v35, %v89_v59 }
  0xfb   :  { %v1649_v47 = vmul.f32 -1.442695, %v297_v33  ;;  %v300_v57 = vadd.f32 %v294_v44, %v90_v49  ;;  %v1668_v49 = vld [vmem:[%s3037_s0 + $0x28] sm:$0xff] }
  0xfc   :  { %v1650_v48 = vmul.f32 -1.442695, %v298_v43 }
  0xfd   :  { %2198 = vpow2.f32 %v1649_v47  ;;  %v1651_v61 = vmul.f32 -1.442695, %v300_v57  ;;  %v1656_v47 = vld [vmem:[%s3037_s0 + $0x10] sm:$0xff]  ;;  %v330_v57 = vpop.permute.xlu0 %329 }
  0xfe   :  { %2200 = vpow2.f32 %v1650_v48  ;;  %514 = vperm.xlu1 %2197, %v1656_v47   ;;  %v1660_v48 = vld [vmem:[%s3037_s0 + $0x18] sm:$0xff]  ;;  %v332_v59 = vmul.f32 %v330_v57, %v2706_v62 }
  0xff   :  { %2202 = vpow2.f32 %v1651_v61  ;;  %v333_v61 = vmul.f32 %v330_v57, %v2711_v5 }
 0x100   :  { %2204 = vtanh.f32 %v299_v60  ;;  %v336_v60 = vadd.f32 %v332_v59, %v2714_v12 }
 0x102   :  { %699 = vperm.xlu1 %2197, %v1660_v48  }
 0x106   :  { %1069 = vperm.xlu1 %2197, %v1668_v49  }
 0x107   :  { %v2199_v7 = vpop.eup %2198 }
 0x108   :  { %v2201_v11 = vpop.eup %2200  ;;  %v304_v13 = vadd.f32 1.0, %v2199_v7 }
 0x109   :  { %v310_v20 = vadd.f32 1.0, %v2201_v11  ;;  %v2203_v25 = vpop.eup %2202 }
 0x10a   :  { %2206 = vrcp.f32 %v304_v13  ;;  %v2205_v26 = vpop.eup %2204  ;;  %v317_v24 = vadd.f32 1.0, %v2203_v25  ;;  %1439 = vperm.xlu1 %2197, %v1676_v55   ;;  %v337_v13 = vadd.f32 %v333_v61, %v2717_v15 }
 0x10b   :  { %2208 = vrcp.f32 %v310_v20 }
 0x10c   :  { %2210 = vrcp.f32 %v317_v24 }
 0x114   :  { %v2207_v30 = vpop.eup %2206 }
 0x115   :  { %v2209_v6 = vpop.eup %2208  ;;  %v321_v63 = vmul.f32 %v2207_v30, %v2205_v26 }
 0x116   :  { %v320_v33 = vmul.f32 0.0, %v2209_v6  ;;  %v2211_v35 = vpop.eup %2210  ;;  %v335_v6 = vmul.f32 %v330_v57, %v2719_v16 }
 0x118   :  { %v2733_v37 = vadd.f32 %v321_v63, %v320_v33  ;;  %v339_v33 = vadd.f32 %v335_v6, %v2724_v31 }
 0x11a   :  { %2212 = vtanh.f32 %v2733_v37 }
 0x124   :  { %v2213_v43 = vpop.eup %2212 }
 0x125   :  { %v324_v44 = vmul.f32 %v2213_v43, %v2211_v35  ;;  %v334_v35 = vmul.f32 %v330_v57, %v2726_v34 }
 0x127   :  { %405 = vmatmul.mubr.f32.vlgmr.msra.gmra.mrb[2].mxu0 %v324_v44  ;;  %476 = vmatmul.mubr.f32.vlgmr.msra.gmra.mrb[2].mxu1 %v324_v44  ;;  %v338_v44 = vadd.f32 %v334_v35, %v2730_v56 }
 0x128   :  { %1813 = vmatpush1.bf16.msra.mxu0 %v2387_v10  ;;  %1845 = vmatpush1.bf16.msra.mxu1 %v2399_v14 }
 0x129   :  { %1815 = vmatprep.subr.bf16.mxu0 %v2412_v18  ;;  %1847 = vmatprep.subr.bf16.mxu1 %v2414_v19 }
 0x12a   :  { %589 = vmatprep.mubr.f32.mxu0 %v2326_v3  ;;  %660 = vmatprep.mubr.f32.mxu1 %v2326_v3 }
 0x12c   :  { %1817 = vmatpush1.bf16.msra.mxu0 %v2426_v23  ;;  %1849 = vmatpush1.bf16.msra.mxu1 %v2439_v27 }
 0x12d   :  { %1819 = vmatprep.subr.bf16.mxu0 %v2441_v28  ;;  %1851 = vmatprep.subr.bf16.mxu1 %v2452_v32 }
 0x130   :  { %1821 = vmatpush1.bf16.msra.mxu0 %v2464_v36  ;;  %1853 = vmatpush1.bf16.msra.mxu1 %v2477_v40 }
 0x131   :  { %1823 = vmatprep.subr.bf16.mxu0 %v2479_v41  ;;  %1855 = vmatprep.subr.bf16.mxu1 %v2491_v45 }
 0x134   :  { %1825 = vmatpush1.bf16.msra.mxu0 %v2512_v52  ;;  %1857 = vmatpush1.bf16.msra.mxu1 %v2516_v53 }
 0x135   :  { %1827 = vmatprep.subr.bf16.mxu0 %v2518_v54  ;;  %1859 = vmatprep.subr.bf16.mxu1 %v2530_v58 }
 0x138   :  { %1829 = vmatpush1.bf16.msra.mxu0 %v2548_v0  ;;  %1861 = vmatpush1.bf16.msra.mxu1 %v2552_v1 }
 0x139   :  { %1831 = vmatprep.subr.bf16.mxu0 %v2554_v2  ;;  %1863 = vmatprep.subr.bf16.mxu1 %v2566_v8 }
 0x13c   :  { %1833 = vmatpush1.bf16.msra.mxu0 %v2584_v17  ;;  %1865 = vmatpush1.bf16.msra.mxu1 %v2591_v21 }
 0x13d   :  { %1835 = vmatprep.subr.bf16.mxu0 %v2593_v22  ;;  %1867 = vmatprep.subr.bf16.mxu1 %v2605_v29 }
 0x140   :  { %1837 = vmatpush1.bf16.msra.mxu0 %v2626_v38  ;;  %1869 = vmatpush1.bf16.msra.mxu1 %v2630_v39 }
 0x141   :  { %1839 = vmatprep.subr.bf16.mxu0 %v2632_v42  ;;  %1871 = vmatprep.subr.bf16.mxu1 %v2641_v46 }
 0x144   :  { %1841 = vmatpush1.bf16.msra.mxu0 %v2653_v50  ;;  %1873 = vmatpush1.bf16.msra.mxu1 %v2657_v51 }
 0x145   :  { %1875 = vmatprep.subr.bf16.mxu0 %v2374_v4  ;;  %1907 = vmatprep.subr.bf16.mxu1 %v2385_v9 }
 0x1fa   :  { %v406_v7 = vpop.f32.mrb[2].mxu0  ;;  %v477_v11 = vpop.f32.mrb[2].mxu1 }
 0x1fb   :  { %v482_v20 = vadd.f32 %v406_v7, %v336_v60  ;;  %v408_v25 = vpop.f32.mrb[3].mxu0  ;;  %v479_v26 = vpop.f32.mrb[3].mxu1  ;;  %v484_v48 = vadd.f32 %v477_v11, %v338_v44 }
 0x1fc   :  { %v483_v30 = vadd.f32 %v408_v25, %v337_v13  ;;  %v485_v43 = vadd.f32 %v479_v26, %v339_v33 }
 0x1fd   :  { %v1653_v63 = vmul.f32 -1.442695, %v482_v20 }
 0x1fe   :  { %v1654_v24 = vmul.f32 -1.442695, %v483_v30  ;;  %v1655_v47 = vmul.f32 -1.442695, %v485_v43 }
 0x1ff   :  { %2214 = vpow2.f32 %v1653_v63 }
 0x200   :  { %2216 = vpow2.f32 %v1654_v24 }
 0x201   :  { %2218 = vpow2.f32 %v1655_v47 }
 0x202   :  { %2220 = vtanh.f32 %v484_v48 }
 0x209   :  { %v2215_v49 = vpop.eup %2214 }
 0x20a   :  { %v2217_v55 = vpop.eup %2216  ;;  %v489_v59 = vadd.f32 1.0, %v2215_v49 }
 0x20b   :  { %v495_v61 = vadd.f32 1.0, %v2217_v55  ;;  %v2219_v60 = vpop.eup %2218 }
 0x20c   :  { %2222 = vrcp.f32 %v489_v59  ;;  %v2221_v7 = vpop.eup %2220  ;;  %v502_v30 = vadd.f32 1.0, %v2219_v60 }
 0x20d   :  { %2224 = vrcp.f32 %v495_v61 }
 0x20e   :  { %2226 = vrcp.f32 %v502_v30 }
 0x216   :  { %v2223_v13 = vpop.eup %2222 }
 0x217   :  { %v2225_v20 = vpop.eup %2224  ;;  %v506_v25 = vmul.f32 %v2223_v13, %v2221_v7 }
 0x218   :  { %v505_v57 = vmul.f32 %v2225_v20, %v2733_v37  ;;  %v2227_v11 = vpop.eup %2226  ;;  %v515_v37 = vpop.permute.xlu1 %514 }
 0x219   :  { %v517_v24 = vmul.f32 %v515_v37, %v2706_v62  ;;  %v518_v33 = vmul.f32 %v515_v37, %v2711_v5  ;;  %v520_v48 = vmul.f32 %v515_v37, %v2719_v16  ;;  %v519_v20 = vmul.f32 %v515_v37, %v2726_v34 }
 0x21a   :  { %v2791_v26 = vadd.f32 %v506_v25, %v505_v57 }
 0x21b   :  { %v521_v35 = vadd.f32 %v517_v24, %v2714_v12  ;;  %v522_v43 = vadd.f32 %v518_v33, %v2717_v15  ;;  %v524_v13 = vadd.f32 %v520_v48, %v2724_v31  ;;  %v523_v30 = vadd.f32 %v519_v20, %v2730_v56 }
 0x21c   :  { %2228 = vtanh.f32 %v2791_v26 }
 0x226   :  { %v2229_v6 = vpop.eup %2228 }
 0x227   :  { %v509_v63 = vmul.f32 %v2229_v6, %v2227_v11 }
 0x229   :  { %590 = vmatmul.mubr.f32.vlgmr.msra.gmra.mrb[4].mxu0 %v509_v63  ;;  %661 = vmatmul.mubr.f32.vlgmr.msra.gmra.mrb[4].mxu1 %v509_v63 }
 0x22a   :  { %1877 = vmatpush1.bf16.msra.mxu0 %v2387_v10  ;;  %1909 = vmatpush1.bf16.msra.mxu1 %v2399_v14 }
 0x22b   :  { %1879 = vmatprep.subr.bf16.mxu0 %v2412_v18  ;;  %1911 = vmatprep.subr.bf16.mxu1 %v2414_v19 }
 0x22c   :  { %774 = vmatprep.mubr.f32.mxu0 %v2326_v3  ;;  %845 = vmatprep.mubr.f32.mxu1 %v2326_v3 }
 0x22e   :  { %1881 = vmatpush1.bf16.msra.mxu0 %v2426_v23  ;;  %1913 = vmatpush1.bf16.msra.mxu1 %v2439_v27 }
 0x22f   :  { %1883 = vmatprep.subr.bf16.mxu0 %v2441_v28  ;;  %1915 = vmatprep.subr.bf16.mxu1 %v2452_v32 }
 0x232   :  { %1885 = vmatpush1.bf16.msra.mxu0 %v2464_v36  ;;  %1917 = vmatpush1.bf16.msra.mxu1 %v2477_v40 }
 0x233   :  { %1887 = vmatprep.subr.bf16.mxu0 %v2479_v41  ;;  %1919 = vmatprep.subr.bf16.mxu1 %v2491_v45 }
 0x236   :  { %1889 = vmatpush1.bf16.msra.mxu0 %v2512_v52  ;;  %1921 = vmatpush1.bf16.msra.mxu1 %v2516_v53 }
 0x237   :  { %1891 = vmatprep.subr.bf16.mxu0 %v2518_v54  ;;  %1923 = vmatprep.subr.bf16.mxu1 %v2530_v58 }
 0x23a   :  { %1893 = vmatpush1.bf16.msra.mxu0 %v2548_v0  ;;  %1925 = vmatpush1.bf16.msra.mxu1 %v2552_v1 }
 0x23b   :  { %1895 = vmatprep.subr.bf16.mxu0 %v2554_v2  ;;  %1927 = vmatprep.subr.bf16.mxu1 %v2566_v8 }
 0x23e   :  { %1897 = vmatpush1.bf16.msra.mxu0 %v2584_v17  ;;  %1929 = vmatpush1.bf16.msra.mxu1 %v2591_v21 }
 0x23f   :  { %1899 = vmatprep.subr.bf16.mxu0 %v2593_v22  ;;  %1931 = vmatprep.subr.bf16.mxu1 %v2605_v29 }
 0x242   :  { %1901 = vmatpush1.bf16.msra.mxu0 %v2626_v38  ;;  %1933 = vmatpush1.bf16.msra.mxu1 %v2630_v39 }
 0x243   :  { %1903 = vmatprep.subr.bf16.mxu0 %v2632_v42  ;;  %1935 = vmatprep.subr.bf16.mxu1 %v2641_v46 }
 0x246   :  { %1905 = vmatpush1.bf16.msra.mxu0 %v2653_v50  ;;  %1937 = vmatpush1.bf16.msra.mxu1 %v2657_v51 }
 0x247   :  { %1939 = vmatprep.subr.bf16.mxu0 %v2374_v4  ;;  %1971 = vmatprep.subr.bf16.mxu1 %v2385_v9 }
 0x2fc   :  { %v591_v44 = vpop.f32.mrb[4].mxu0  ;;  %v662_v47 = vpop.f32.mrb[4].mxu1 }
 0x2fd   :  { %v667_v49 = vadd.f32 %v591_v44, %v521_v35  ;;  %v593_v55 = vpop.f32.mrb[5].mxu0  ;;  %v664_v59 = vpop.f32.mrb[5].mxu1  ;;  %v669_v11 = vadd.f32 %v662_v47, %v523_v30 }
 0x2fe   :  { %v668_v61 = vadd.f32 %v593_v55, %v522_v43  ;;  %v670_v25 = vadd.f32 %v664_v59, %v524_v13 }
 0x2ff   :  { %v1657_v60 = vmul.f32 -1.442695, %v667_v49 }
 0x300   :  { %v1658_v7 = vmul.f32 -1.442695, %v668_v61  ;;  %v1659_v57 = vmul.f32 -1.442695, %v670_v25 }
 0x301   :  { %2230 = vpow2.f32 %v1657_v60 }
 0x302   :  { %2232 = vpow2.f32 %v1658_v7 }
 0x303   :  { %2234 = vpow2.f32 %v1659_v57 }
 0x304   :  { %2236 = vtanh.f32 %v669_v11 }
 0x30b   :  { %v2231_v6 = vpop.eup %2230 }
 0x30c   :  { %v2233_v63 = vpop.eup %2232  ;;  %v674_v24 = vadd.f32 1.0, %v2231_v6 }
 0x30d   :  { %v680_v33 = vadd.f32 1.0, %v2233_v63  ;;  %v2235_v35 = vpop.eup %2234 }
 0x30e   :  { %2238 = vrcp.f32 %v674_v24  ;;  %v2237_v43 = vpop.eup %2236  ;;  %v687_v37 = vadd.f32 1.0, %v2235_v35 }
 0x30f   :  { %2240 = vrcp.f32 %v680_v33 }
 0x310   :  { %2242 = vrcp.f32 %v687_v37 }
 0x318   :  { %v2239_v44 = vpop.eup %2238 }
 0x319   :  { %v2241_v48 = vpop.eup %2240  ;;  %v691_v49 = vmul.f32 %v2239_v44, %v2237_v43 }
 0x31a   :  { %v690_v55 = vmul.f32 %v2241_v48, %v2791_v26  ;;  %v2243_v47 = vpop.eup %2242  ;;  %v700_v26 = vpop.permute.xlu1 %699 }
 0x31b   :  { %v702_v7 = vmul.f32 %v700_v26, %v2706_v62  ;;  %v703_v13 = vmul.f32 %v700_v26, %v2711_v5  ;;  %v705_v33 = vmul.f32 %v700_v26, %v2719_v16  ;;  %v704_v48 = vmul.f32 %v700_v26, %v2726_v34 }
 0x31c   :  { %v2837_v59 = vadd.f32 %v691_v49, %v690_v55 }
 0x31d   :  { %v706_v20 = vadd.f32 %v702_v7, %v2714_v12  ;;  %v707_v57 = vadd.f32 %v703_v13, %v2717_v15  ;;  %v709_v44 = vadd.f32 %v705_v33, %v2724_v31  ;;  %v708_v37 = vadd.f32 %v704_v48, %v2730_v56 }
 0x31e   :  { %2244 = vtanh.f32 %v2837_v59 }
 0x328   :  { %v2245_v61 = vpop.eup %2244 }
 0x329   :  { %v694_v60 = vmul.f32 %v2245_v61, %v2243_v47 }
 0x32b   :  { %775 = vmatmul.mubr.f32.vlgmr.msra.gmra.mrb[6].mxu0 %v694_v60  ;;  %846 = vmatmul.mubr.f32.vlgmr.msra.gmra.mrb[6].mxu1 %v694_v60 }
 0x32c   :  { %1941 = vmatpush1.bf16.msra.mxu0 %v2387_v10  ;;  %1973 = vmatpush1.bf16.msra.mxu1 %v2399_v14 }
 0x32d   :  { %1943 = vmatprep.subr.bf16.mxu0 %v2412_v18  ;;  %1975 = vmatprep.subr.bf16.mxu1 %v2414_v19 }
 0x32e   :  { %959 = vmatprep.mubr.f32.mxu0 %v2326_v3  ;;  %1030 = vmatprep.mubr.f32.mxu1 %v2326_v3 }
 0x330   :  { %1945 = vmatpush1.bf16.msra.mxu0 %v2426_v23  ;;  %1977 = vmatpush1.bf16.msra.mxu1 %v2439_v27 }
 0x331   :  { %1947 = vmatprep.subr.bf16.mxu0 %v2441_v28  ;;  %1979 = vmatprep.subr.bf16.mxu1 %v2452_v32 }
 0x334   :  { %1949 = vmatpush1.bf16.msra.mxu0 %v2464_v36  ;;  %1981 = vmatpush1.bf16.msra.mxu1 %v2477_v40 }
 0x335   :  { %1951 = vmatprep.subr.bf16.mxu0 %v2479_v41  ;;  %1983 = vmatprep.subr.bf16.mxu1 %v2491_v45 }
 0x338   :  { %1953 = vmatpush1.bf16.msra.mxu0 %v2512_v52  ;;  %1985 = vmatpush1.bf16.msra.mxu1 %v2516_v53 }
 0x339   :  { %1955 = vmatprep.subr.bf16.mxu0 %v2518_v54  ;;  %1987 = vmatprep.subr.bf16.mxu1 %v2530_v58 }
 0x33c   :  { %1957 = vmatpush1.bf16.msra.mxu0 %v2548_v0  ;;  %1989 = vmatpush1.bf16.msra.mxu1 %v2552_v1 }
 0x33d   :  { %1959 = vmatprep.subr.bf16.mxu0 %v2554_v2  ;;  %1991 = vmatprep.subr.bf16.mxu1 %v2566_v8 }
 0x340   :  { %1961 = vmatpush1.bf16.msra.mxu0 %v2584_v17  ;;  %1993 = vmatpush1.bf16.msra.mxu1 %v2591_v21 }
 0x341   :  { %1963 = vmatprep.subr.bf16.mxu0 %v2593_v22  ;;  %1995 = vmatprep.subr.bf16.mxu1 %v2605_v29 }
 0x344   :  { %1965 = vmatpush1.bf16.msra.mxu0 %v2626_v38  ;;  %1997 = vmatpush1.bf16.msra.mxu1 %v2630_v39 }
 0x345   :  { %1967 = vmatprep.subr.bf16.mxu0 %v2632_v42  ;;  %1999 = vmatprep.subr.bf16.mxu1 %v2641_v46 }
 0x348   :  { %1969 = vmatpush1.bf16.msra.mxu0 %v2653_v50  ;;  %2001 = vmatpush1.bf16.msra.mxu1 %v2657_v51 }
 0x349   :  { %2003 = vmatprep.subr.bf16.mxu0 %v2374_v4  ;;  %2035 = vmatprep.subr.bf16.mxu1 %v2385_v9 }
 0x3fe   :  { %v776_v25 = vpop.f32.mrb[6].mxu0  ;;  %v847_v30 = vpop.f32.mrb[6].mxu1 }
 0x3ff   :  { %v852_v11 = vadd.f32 %v776_v25, %v706_v20  ;;  %v778_v6 = vpop.f32.mrb[7].mxu0  ;;  %v849_v63 = vpop.f32.mrb[7].mxu1  ;;  %v854_v47 = vadd.f32 %v847_v30, %v708_v37 }
 0x400   :  { %v853_v24 = vadd.f32 %v778_v6, %v707_v57  ;;  %v855_v49 = vadd.f32 %v849_v63, %v709_v44 }
 0x401   :  { %v1661_v35 = vmul.f32 -1.442695, %v852_v11 }
 0x402   :  { %v1662_v43 = vmul.f32 -1.442695, %v853_v24  ;;  %v1663_v55 = vmul.f32 -1.442695, %v855_v49 }
 0x403   :  { %2246 = vpow2.f32 %v1661_v35 }
 0x404   :  { %2248 = vpow2.f32 %v1662_v43 }
 0x405   :  { %2250 = vpow2.f32 %v1663_v55 }
 0x406   :  { %2252 = vtanh.f32 %v854_v47 }
 0x40d   :  { %v2247_v61 = vpop.eup %2246 }
 0x40e   :  { %v2249_v60 = vpop.eup %2248  ;;  %v859_v7 = vadd.f32 1.0, %v2247_v61 }
 0x40f   :  { %v865_v13 = vadd.f32 1.0, %v2249_v60  ;;  %v2251_v20 = vpop.eup %2250 }
 0x410   :  { %2254 = vrcp.f32 %v859_v7  ;;  %v2253_v25 = vpop.eup %2252  ;;  %v872_v24 = vadd.f32 1.0, %v2251_v20 }
 0x411   :  { %2256 = vrcp.f32 %v865_v13 }
 0x412   :  { %2258 = vrcp.f32 %v872_v24 }
 0x41a   :  { %v2255_v57 = vpop.eup %2254 }
 0x41b   :  { %v2257_v11 = vpop.eup %2256  ;;  %v876_v6 = vmul.f32 %v2255_v57, %v2253_v25 }
 0x41c   :  { %v875_v26 = vmul.f32 %v2257_v11, %v2837_v59  ;;  %v2259_v30 = vpop.eup %2258  ;;  %v885_v59 = vpop.permute.xlu0 %884 }
 0x41d   :  { %v887_v43 = vmul.f32 %v885_v59, %v2706_v62  ;;  %v888_v44 = vmul.f32 %v885_v59, %v2711_v5  ;;  %v890_v13 = vmul.f32 %v885_v59, %v2719_v16  ;;  %v889_v11 = vmul.f32 %v885_v59, %v2726_v34 }
 0x41e   :  { %v2883_v63 = vadd.f32 %v876_v6, %v875_v26 }
 0x41f   :  { %v891_v48 = vadd.f32 %v887_v43, %v2714_v12  ;;  %v892_v55 = vadd.f32 %v888_v44, %v2717_v15  ;;  %v894_v57 = vadd.f32 %v890_v13, %v2724_v31  ;;  %v893_v24 = vadd.f32 %v889_v11, %v2730_v56 }
 0x420   :  { %2260 = vtanh.f32 %v2883_v63 }
 0x42a   :  { %v2261_v33 = vpop.eup %2260 }
 0x42b   :  { %v879_v35 = vmul.f32 %v2261_v33, %v2259_v30 }
 0x42d   :  { %960 = vmatmul.mubr.f32.vlgmr.msra.gmra.mrb[8].mxu0 %v879_v35  ;;  %1031 = vmatmul.mubr.f32.vlgmr.msra.gmra.mrb[8].mxu1 %v879_v35 }
 0x42e   :  { %2005 = vmatpush1.bf16.msra.mxu0 %v2387_v10  ;;  %2037 = vmatpush1.bf16.msra.mxu1 %v2399_v14 }
 0x42f   :  { %2007 = vmatprep.subr.bf16.mxu0 %v2412_v18  ;;  %2039 = vmatprep.subr.bf16.mxu1 %v2414_v19 }
 0x430   :  { %1144 = vmatprep.mubr.f32.mxu0 %v2326_v3  ;;  %1215 = vmatprep.mubr.f32.mxu1 %v2326_v3 }
 0x432   :  { %2009 = vmatpush1.bf16.msra.mxu0 %v2426_v23  ;;  %2041 = vmatpush1.bf16.msra.mxu1 %v2439_v27 }
 0x433   :  { %2011 = vmatprep.subr.bf16.mxu0 %v2441_v28  ;;  %2043 = vmatprep.subr.bf16.mxu1 %v2452_v32 }
 0x436   :  { %2013 = vmatpush1.bf16.msra.mxu0 %v2464_v36  ;;  %2045 = vmatpush1.bf16.msra.mxu1 %v2477_v40 }
 0x437   :  { %2015 = vmatprep.subr.bf16.mxu0 %v2479_v41  ;;  %2047 = vmatprep.subr.bf16.mxu1 %v2491_v45 }
 0x43a   :  { %2017 = vmatpush1.bf16.msra.mxu0 %v2512_v52  ;;  %2049 = vmatpush1.bf16.msra.mxu1 %v2516_v53 }
 0x43b   :  { %2019 = vmatprep.subr.bf16.mxu0 %v2518_v54  ;;  %2051 = vmatprep.subr.bf16.mxu1 %v2530_v58 }
 0x43e   :  { %2021 = vmatpush1.bf16.msra.mxu0 %v2548_v0  ;;  %2053 = vmatpush1.bf16.msra.mxu1 %v2552_v1 }
 0x43f   :  { %2023 = vmatprep.subr.bf16.mxu0 %v2554_v2  ;;  %2055 = vmatprep.subr.bf16.mxu1 %v2566_v8 }
 0x442   :  { %2025 = vmatpush1.bf16.msra.mxu0 %v2584_v17  ;;  %2057 = vmatpush1.bf16.msra.mxu1 %v2591_v21 }
 0x443   :  { %2027 = vmatprep.subr.bf16.mxu0 %v2593_v22  ;;  %2059 = vmatprep.subr.bf16.mxu1 %v2605_v29 }
 0x446   :  { %2029 = vmatpush1.bf16.msra.mxu0 %v2626_v38  ;;  %2061 = vmatpush1.bf16.msra.mxu1 %v2630_v39 }
 0x447   :  { %2031 = vmatprep.subr.bf16.mxu0 %v2632_v42  ;;  %2063 = vmatprep.subr.bf16.mxu1 %v2641_v46 }
 0x44a   :  { %2033 = vmatpush1.bf16.msra.mxu0 %v2653_v50  ;;  %2065 = vmatpush1.bf16.msra.mxu1 %v2657_v51 }
 0x44b   :  { %2067 = vmatprep.subr.bf16.mxu0 %v2374_v4  ;;  %2099 = vmatprep.subr.bf16.mxu1 %v2385_v9 }
 0x500   :  { %v961_v49 = vpop.f32.mrb[8].mxu0  ;;  %v1032_v37 = vpop.f32.mrb[8].mxu1 }
 0x501   :  { %v1037_v47 = vadd.f32 %v961_v49, %v891_v48  ;;  %v963_v61 = vpop.f32.mrb[9].mxu0  ;;  %v1034_v60 = vpop.f32.mrb[9].mxu1  ;;  %v1039_v30 = vadd.f32 %v1032_v37, %v893_v24 }
 0x502   :  { %v1038_v7 = vadd.f32 %v963_v61, %v892_v55  ;;  %v1040_v6 = vadd.f32 %v1034_v60, %v894_v57 }
 0x503   :  { %v1665_v20 = vmul.f32 -1.442695, %v1037_v47 }
 0x504   :  { %v1666_v25 = vmul.f32 -1.442695, %v1038_v7  ;;  %v1667_v26 = vmul.f32 -1.442695, %v1040_v6 }
 0x505   :  { %2262 = vpow2.f32 %v1665_v20 }
 0x506   :  { %2264 = vpow2.f32 %v1666_v25 }
 0x507   :  { %2266 = vpow2.f32 %v1667_v26 }
 0x508   :  { %2268 = vtanh.f32 %v1039_v30 }
 0x50f   :  { %v2263_v33 = vpop.eup %2262 }
 0x510   :  { %v2265_v35 = vpop.eup %2264  ;;  %v1044_v43 = vadd.f32 1.0, %v2263_v33 }
 0x511   :  { %v1050_v44 = vadd.f32 1.0, %v2265_v35  ;;  %v2267_v48 = vpop.eup %2266 }
 0x512   :  { %2270 = vrcp.f32 %v1044_v43  ;;  %v2269_v49 = vpop.eup %2268  ;;  %v1057_v7 = vadd.f32 1.0, %v2267_v48 }
 0x513   :  { %2272 = vrcp.f32 %v1050_v44 }
 0x514   :  { %2274 = vrcp.f32 %v1057_v7 }
 0x51c   :  { %v2271_v55 = vpop.eup %2270 }
 0x51d   :  { %v2273_v47 = vpop.eup %2272  ;;  %v1061_v61 = vmul.f32 %v2271_v55, %v2269_v49 }
 0x51e   :  { %v1060_v59 = vmul.f32 %v2273_v47, %v2883_v63  ;;  %v2275_v37 = vpop.eup %2274  ;;  %v1070_v63 = vpop.permute.xlu1 %1069 }
 0x51f   :  { %v1072_v25 = vmul.f32 %v1070_v63, %v2706_v62  ;;  %v1073_v57 = vmul.f32 %v1070_v63, %v2711_v5  ;;  %v1075_v44 = vmul.f32 %v1070_v63, %v2719_v16  ;;  %v1074_v49 = vmul.f32 %v1070_v63, %v2726_v34 }
 0x520   :  { %v2929_v60 = vadd.f32 %v1061_v61, %v1060_v59 }
 0x521   :  { %v1076_v11 = vadd.f32 %v1072_v25, %v2714_v12  ;;  %v1077_v26 = vadd.f32 %v1073_v57, %v2717_v15  ;;  %v1078_v47 = vadd.f32 %v1074_v49, %v2730_v56 }
 0x522   :  { %2276 = vtanh.f32 %v2929_v60  ;;  %v1440_v49 = vpop.permute.xlu1 %1439 }
 0x52c   :  { %v2277_v13 = vpop.eup %2276 }
 0x52d   :  { %v1064_v20 = vmul.f32 %v2277_v13, %v2275_v37 }
 0x52f   :  { %1145 = vmatmul.mubr.f32.vlgmr.msra.gmra.mrb[10].mxu0 %v1064_v20  ;;  %1216 = vmatmul.mubr.f32.vlgmr.msra.gmra.mrb[10].mxu1 %v1064_v20 }
 0x530   :  { %2069 = vmatpush1.bf16.msra.mxu0 %v2387_v10  ;;  %2101 = vmatpush1.bf16.msra.mxu1 %v2399_v14 }
 0x531   :  { %2071 = vmatprep.subr.bf16.mxu0 %v2412_v18  ;;  %2103 = vmatprep.subr.bf16.mxu1 %v2414_v19 }
 0x532   :  { %1329 = vmatprep.mubr.f32.mxu0 %v2326_v3  ;;  %1400 = vmatprep.mubr.f32.mxu1 %v2326_v3 }
 0x534   :  { %2073 = vmatpush1.bf16.msra.mxu0 %v2426_v23  ;;  %2105 = vmatpush1.bf16.msra.mxu1 %v2439_v27 }
 0x535   :  { %2075 = vmatprep.subr.bf16.mxu0 %v2441_v28  ;;  %2107 = vmatprep.subr.bf16.mxu1 %v2452_v32 }
 0x538   :  { %2077 = vmatpush1.bf16.msra.mxu0 %v2464_v36  ;;  %2109 = vmatpush1.bf16.msra.mxu1 %v2477_v40 }
 0x539   :  { %2079 = vmatprep.subr.bf16.mxu0 %v2479_v41  ;;  %2111 = vmatprep.subr.bf16.mxu1 %v2491_v45 }
 0x53c   :  { %2081 = vmatpush1.bf16.msra.mxu0 %v2512_v52  ;;  %2113 = vmatpush1.bf16.msra.mxu1 %v2516_v53 }
 0x53d   :  { %2083 = vmatprep.subr.bf16.mxu0 %v2518_v54  ;;  %2115 = vmatprep.subr.bf16.mxu1 %v2530_v58 }
 0x540   :  { %2085 = vmatpush1.bf16.msra.mxu0 %v2548_v0  ;;  %2117 = vmatpush1.bf16.msra.mxu1 %v2552_v1 }
 0x541   :  { %2087 = vmatprep.subr.bf16.mxu0 %v2554_v2  ;;  %2119 = vmatprep.subr.bf16.mxu1 %v2566_v8 }
 0x544   :  { %2089 = vmatpush1.bf16.msra.mxu0 %v2584_v17  ;;  %2121 = vmatpush1.bf16.msra.mxu1 %v2591_v21 }
 0x545   :  { %2091 = vmatprep.subr.bf16.mxu0 %v2593_v22  ;;  %2123 = vmatprep.subr.bf16.mxu1 %v2605_v29 }
 0x548   :  { %2093 = vmatpush1.bf16.msra.mxu0 %v2626_v38  ;;  %2125 = vmatpush1.bf16.msra.mxu1 %v2630_v39 }
 0x549   :  { %2095 = vmatprep.subr.bf16.mxu0 %v2632_v42  ;;  %2127 = vmatprep.subr.bf16.mxu1 %v2641_v46 }
 0x54c   :  { %2097 = vmatpush1.bf16.msra.mxu0 %v2653_v50  ;;  %2129 = vmatpush1.bf16.msra.mxu1 %v2657_v51 }
 0x54d   :  { %2131 = vmatprep.subr.bf16.mxu0 %v2374_v4  ;;  %2163 = vmatprep.subr.bf16.mxu1 %v2385_v9  ;;  %v1079_v9 = vadd.f32 %v1075_v44, %v2724_v31 }
 0x602   :  { %v1146_v6 = vpop.f32.mrb[10].mxu0  ;;  %v1217_v24 = vpop.f32.mrb[10].mxu1 }
 0x603   :  { %v1222_v30 = vadd.f32 %v1146_v6, %v1076_v11  ;;  %v1148_v33 = vpop.f32.mrb[11].mxu0  ;;  %v1219_v35 = vpop.f32.mrb[11].mxu1  ;;  %v1224_v7 = vadd.f32 %v1217_v24, %v1078_v47  ;;  %v1443_v47 = vmul.f32 %v1440_v49, %v2711_v5 }
 0x604   :  { %v1223_v43 = vadd.f32 %v1148_v33, %v1077_v26  ;;  %v1225_v55 = vadd.f32 %v1219_v35, %v1079_v9  ;;  %v11_v9 = vstv %s3040_s5 }
 0x605   :  { %v1669_v4 = vmul.f32 -1.442695, %v1222_v30  ;;  %12 = vst [vmem:[#allocation4] sm:$0x1] %v11_v9 }
 0x606   :  { %v1670_v48 = vmul.f32 -1.442695, %v1223_v43  ;;  %v1671_v61 = vmul.f32 -1.442695, %v1225_v55  ;;  %v1442_v55 = vmul.f32 %v1440_v49, %v2706_v62 }
 0x607   :  { %2278 = vpow2.f32 %v1669_v4 }
 0x608   :  { %2280 = vpow2.f32 %v1670_v48 }
 0x609   :  { %2282 = vpow2.f32 %v1671_v61  ;;  %v1446_v61 = vadd.f32 %v1442_v55, %v2714_v12 }
 0x60a   :  { %2284 = vtanh.f32 %v1224_v7 }
 0x611   :  { %v2279_v59 = vpop.eup %2278 }
 0x612   :  { %v2281_v37 = vpop.eup %2280  ;;  %v1229_v13 = vadd.f32 1.0, %v2279_v59 }
 0x613   :  { %v1235_v20 = vadd.f32 1.0, %v2281_v37  ;;  %v2283_v25 = vpop.eup %2282  ;;  %v1447_v37 = vadd.f32 %v1443_v47, %v2717_v15 }
 0x614   :  { %2286 = vrcp.f32 %v1229_v13  ;;  %v2285_v57 = vpop.eup %2284  ;;  %v1242_v30 = vadd.f32 1.0, %v2283_v25 }
 0x615   :  { %2288 = vrcp.f32 %v1235_v20 }
 0x616   :  { %2290 = vrcp.f32 %v1242_v30 }
 0x61e   :  { %v2287_v11 = vpop.eup %2286 }
 0x61f   :  { %v2289_v6 = vpop.eup %2288  ;;  %v1246_v26 = vmul.f32 %v2287_v11, %v2285_v57  ;;  %v1445_v57 = vmul.f32 %v1440_v49, %v2719_v16 }
 0x620   :  { %v1245_v63 = vmul.f32 %v2289_v6, %v2929_v60  ;;  %v2291_v24 = vpop.eup %2290 }
 0x622   :  { %v2975_v33 = vadd.f32 %v1246_v26, %v1245_v63 }
 0x624   :  { %2292 = vtanh.f32 %v2975_v33 }
 0x62e   :  { %v2293_v35 = vpop.eup %2292 }
 0x62f   :  { %v1249_v43 = vmul.f32 %v2293_v35, %v2291_v24 }
 0x631   :  { %1330 = vmatmul.mubr.f32.vlgmr.msra.gmra.mrb[12].mxu0 %v1249_v43  ;;  %1401 = vmatmul.mubr.f32.vlgmr.msra.gmra.mrb[12].mxu1 %v1249_v43 }
 0x632   :  { %2133 = vmatpush1.bf16.msra.mxu0 %v2387_v10  ;;  %2165 = vmatpush1.bf16.msra.mxu1 %v2399_v14 }
 0x633   :  { %2135 = vmatprep.subr.bf16.mxu0 %v2412_v18  ;;  %2167 = vmatprep.subr.bf16.mxu1 %v2414_v19 }
 0x634   :  { %1514 = vmatprep.mubr.f32.mxu0 %v2326_v3  ;;  %1585 = vmatprep.mubr.f32.mxu1 %v2326_v3  ;;  %v1255_v3 = vpop.permute.xlu0 %1254 }
 0x635   :  { %v1257_v10 = vmul.f32 %v1255_v3, %v2706_v62  ;;  %v1258_v14 = vmul.f32 %v1255_v3, %v2711_v5  ;;  %v1449_v62 = vadd.f32 %v1445_v57, %v2724_v31  ;;  %v1444_v5 = vmul.f32 %v1440_v49, %v2726_v34 }
 0x636   :  { %2137 = vmatpush1.bf16.msra.mxu0 %v2426_v23  ;;  %2169 = vmatpush1.bf16.msra.mxu1 %v2439_v27 }
 0x637   :  { %2139 = vmatprep.subr.bf16.mxu0 %v2441_v28  ;;  %2171 = vmatprep.subr.bf16.mxu1 %v2452_v32  ;;  %v1261_v18 = vadd.f32 %v1257_v10, %v2714_v12  ;;  %v1262_v27 = vadd.f32 %v1258_v14, %v2717_v15  ;;  %v1448_v12 = vadd.f32 %v1444_v5, %v2730_v56 }
 0x63a   :  { %2141 = vmatpush1.bf16.msra.mxu0 %v2464_v36  ;;  %2173 = vmatpush1.bf16.msra.mxu1 %v2477_v40 }
 0x63b   :  { %2143 = vmatprep.subr.bf16.mxu0 %v2479_v41  ;;  %2175 = vmatprep.subr.bf16.mxu1 %v2491_v45  ;;  %v1260_v41 = vmul.f32 %v1255_v3, %v2719_v16 }
 0x63e   :  { %2145 = vmatpush1.bf16.msra.mxu0 %v2512_v52  ;;  %2177 = vmatpush1.bf16.msra.mxu1 %v2516_v53  ;;  %v1264_v53 = vadd.f32 %v1260_v41, %v2724_v31 }
 0x63f   :  { %2147 = vmatprep.subr.bf16.mxu0 %v2518_v54  ;;  %2179 = vmatprep.subr.bf16.mxu1 %v2530_v58  ;;  %v1259_v54 = vmul.f32 %v1255_v3, %v2726_v34 }
 0x642   :  { %2149 = vmatpush1.bf16.msra.mxu0 %v2548_v0  ;;  %2181 = vmatpush1.bf16.msra.mxu1 %v2552_v1  ;;  %v1263_v0 = vadd.f32 %v1259_v54, %v2730_v56 }
 0x643   :  { %2151 = vmatprep.subr.bf16.mxu0 %v2554_v2  ;;  %2183 = vmatprep.subr.bf16.mxu1 %v2566_v8 }
 0x646   :  { %2153 = vmatpush1.bf16.msra.mxu0 %v2584_v17  ;;  %2185 = vmatpush1.bf16.msra.mxu1 %v2591_v21 }
 0x647   :  { %2155 = vmatprep.subr.bf16.mxu0 %v2593_v22  ;;  %2187 = vmatprep.subr.bf16.mxu1 %v2605_v29 }
 0x64a   :  { %2157 = vmatpush1.bf16.msra.mxu0 %v2626_v38  ;;  %2189 = vmatpush1.bf16.msra.mxu1 %v2630_v39 }
 0x64b   :  { %2159 = vmatprep.subr.bf16.mxu0 %v2632_v42  ;;  %2191 = vmatprep.subr.bf16.mxu1 %v2641_v46 }
 0x64e   :  { %2161 = vmatpush1.bf16.msra.mxu0 %v2653_v50  ;;  %2193 = vmatpush1.bf16.msra.mxu1 %v2657_v51 }
 0x704   :  { %v1331_v19 = vpop.f32.mrb[12].mxu0  ;;  %v1402_v23 = vpop.f32.mrb[12].mxu1 }
 0x705   :  { %v1407_v28 = vadd.f32 %v1331_v19, %v1261_v18  ;;  %v1333_v32 = vpop.f32.mrb[13].mxu0  ;;  %v1404_v36 = vpop.f32.mrb[13].mxu1  ;;  %v1409_v2 = vadd.f32 %v1402_v23, %v1263_v0 }
 0x706   :  { %v1408_v40 = vadd.f32 %v1333_v32, %v1262_v27  ;;  %v1410_v58 = vadd.f32 %v1404_v36, %v1264_v53  ;;  %v1680_v27 = vld [vmem:[%s3041_s4] ss:$0 sm:$0xff] }
 0x707   :  { %v1673_v45 = vmul.f32 -1.442695, %v1407_v28  ;;  %v1681_v36 = vld [vmem:[#allocation4] ss:$0 sm:$0xff] }
 0x708   :  { %v1674_v52 = vmul.f32 -1.442695, %v1408_v40  ;;  %v1675_v1 = vmul.f32 -1.442695, %v1410_v58 }
 0x709   :  { %2294 = vpow2.f32 %v1673_v45 }
 0x70a   :  { %2296 = vpow2.f32 %v1674_v52 }
 0x70b   :  { %2298 = vpow2.f32 %v1675_v1 }
 0x70c   :  { %2300 = vtanh.f32 %v1409_v2 }
 0x713   :  { %v2295_v8 = vpop.eup %2294 }
 0x714   :  { %v2297_v17 = vpop.eup %2296  ;;  %v1414_v21 = vadd.f32 1.0, %v2295_v8 }
 0x715   :  { %v1420_v22 = vadd.f32 1.0, %v2297_v17  ;;  %v2299_v29 = vpop.eup %2298 }
 0x716   :  { %2302 = vrcp.f32 %v1414_v21  ;;  %v2301_v38 = vpop.eup %2300  ;;  %v1427_v50 = vadd.f32 1.0, %v2299_v29 }
 0x717   :  { %2304 = vrcp.f32 %v1420_v22 }
 0x718   :  { %2306 = vrcp.f32 %v1427_v50 }
 0x720   :  { %v2303_v39 = vpop.eup %2302 }
 0x721   :  { %v2305_v42 = vpop.eup %2304  ;;  %v1431_v46 = vmul.f32 %v2303_v39, %v2301_v38 }
 0x722   :  { %v1430_v51 = vmul.f32 %v2305_v42, %v2975_v33  ;;  %v2307_v44 = vpop.eup %2306 }
 0x724   :  { %v1432_v60 = vadd.f32 %v1431_v46, %v1430_v51 }
 0x726   :  { %2308 = vtanh.f32 %v1432_v60 }
 0x730   :  { %v2309_v4 = vpop.eup %2308 }
 0x731   :  { %v1434_v48 = vmul.f32 %v2309_v4, %v2307_v44 }
 0x733   :  { %1515 = vmatmul.mubr.f32.vlgmr.msra.gmra.mrb[14].mxu0 %v1434_v48  ;;  %1586 = vmatmul.mubr.f32.vlgmr.msra.gmra.mrb[14].mxu1 %v1434_v48 }
 0x806   :  { %v1516_v7 = vpop.f32.mrb[14].mxu0  ;;  %v1587_v59 = vpop.f32.mrb[14].mxu1 }
 0x807   :  { %v1592_v13 = vadd.f32 %v1516_v7, %v1446_v61  ;;  %v1518_v20 = vpop.f32.mrb[15].mxu0  ;;  %v1589_v25 = vpop.f32.mrb[15].mxu1  ;;  %v1594_v33 = vadd.f32 %v1587_v59, %v1448_v12 }
 0x808   :  { %v1593_v11 = vadd.f32 %v1518_v20, %v1447_v37  ;;  %v1595_v30 = vadd.f32 %v1589_v25, %v1449_v62 }
 0x809   :  { %v1677_v6 = vmul.f32 -1.442695, %v1592_v13 }
 0x80a   :  { %v1678_v26 = vmul.f32 -1.442695, %v1593_v11  ;;  %v1679_v63 = vmul.f32 -1.442695, %v1595_v30 }
 0x80b   :  { %2310 = vpow2.f32 %v1677_v6 }
 0x80c   :  { %2312 = vpow2.f32 %v1678_v26 }
 0x80d   :  { %2314 = vpow2.f32 %v1679_v63 }
 0x80e   :  { %2316 = vtanh.f32 %v1594_v33 }
 0x815   :  { %v2311_v15 = vpop.eup %2310 }
 0x816   :  { %v2313_v24 = vpop.eup %2312  ;;  %v1599_v35 = vadd.f32 1.0, %v2311_v15 }
 0x817   :  { %v1605_v16 = vadd.f32 1.0, %v2313_v24  ;;  %v2315_v43 = vpop.eup %2314 }
 0x818   :  { %2318 = vrcp.f32 %v1599_v35  ;;  %v2317_v3 = vpop.eup %2316  ;;  %v1612_v18 = vadd.f32 1.0, %v2315_v43 }
 0x819   :  { %2320 = vrcp.f32 %v1605_v16 }
 0x81a   :  { %2322 = vrcp.f32 %v1612_v18 }
 0x822   :  { %v2319_v10 = vpop.eup %2318 }
 0x823   :  { %v2321_v14 = vpop.eup %2320  ;;  %v1616_v31 = vmul.f32 %v2319_v10, %v2317_v3 }
 0x824   :  { %v1615_v34 = vmul.f32 %v2321_v14, %v1432_v60  ;;  %v2323_v56 = vpop.eup %2322 }
 0x826   :  { %v1617_v19 = vadd.f32 %v1616_v31, %v1615_v34 }
 0x828   :  { %2324 = vtanh.f32 %v1617_v19 }
 0x832   :  { %v2325_v23 = vpop.eup %2324 }
 0x833   :  { %v1619_v28 = vmul.f32 %v2325_v23, %v2323_v56 }
 0x835   :  { %v1632_v32 = vmul.f32 %v1680_v27, %v1619_v28 }
 0x837   :  { %1633 = vadd.xlane.f32.xlu0 %v1632_v32 }
 0x8c4   :  { %v1634_v40 = vpop.xlane.xlu0 %1633 }
 0x8c5   :  { %v1642_v41 = vadd.f32 %v1681_v36, %v1634_v40 }
 0x8c7   :  { %1644 = vst.msk [vmem:[%s3042_s6] sm:$0xff] %vm1643_vm0, %v1642_v41 }

</bundles_post_ra>
